<compile_context>
chip_gen: v5e
topology: v5e:2x2
jax: 0.10.0
libtpu: 0.0.40
codegen_flags: <defaults>
</compile_context>

<pallas_src>
import functools
import math

import jax
import jax.numpy as jnp
from jax import lax
from jax.experimental import pallas as pl
from jax.experimental.pallas import tpu as pltpu

# MLP architecture fixed by the module:
# Linear(2F,256), Linear(256,128), ReLU, Linear(128,64), ReLU, Linear(64,2)
H1, H2, H3, NCLS = 256, 128, 64, 2

MATMUL_DTYPE = jnp.bfloat16        # MXU input dtype; accumulation stays f32
SUBLANES, LANES = 8, 128
_VMEM_LIMIT = 48 * 1024 * 1024     # < v7x's 64 MiB physical, ample on v5e/v6e

# torch.optim.Adam(lr=2e-5, weight_decay=2e-5): L2 term added to the gradient.
_LR, _B1, _B2, _EPS, _WD = 2e-5, 0.9, 0.999, 1e-8, 2e-5

# dot_general dimension numbers.
_TN = (((0,), (0,)), ((), ()))     # contract leading dims:  x^T @ y
_NT = (((1,), (1,)), ((), ()))     # contract trailing dims: x @ y^T


def _mm(x, w):
    """bf16 MXU matmul with f32 accumulation."""
    return jnp.dot(x.astype(MATMUL_DTYPE), w.astype(MATMUL_DTYPE),
                   preferred_element_type=jnp.float32)


def _mm_tn(x, y):
    return lax.dot_general(x.astype(MATMUL_DTYPE), y.astype(MATMUL_DTYPE), _TN,
                           preferred_element_type=jnp.float32)


def _mm_nt(x, y):
    return lax.dot_general(x.astype(MATMUL_DTYPE), y.astype(MATMUL_DTYPE), _NT,
                           preferred_element_type=jnp.float32)


def _softplus(x):
    # Stable softplus written with ops that lower cleanly in Mosaic.
    return jnp.maximum(x, 0.0) + jnp.log(1.0 + jnp.exp(-jnp.abs(x)))


# ----------------------------------------------------------------------------
# Pallas kernels
# ----------------------------------------------------------------------------
def _cross_fwd_kernel(a_ref, b_ref, w1a_ref, w1b_ref, b1_ref, w2_ref, b2_ref,
                      w3_ref, b3_ref, w4d_ref, b4d_ref, out_ref,
                      *, bs, ta, tb):
    """Fused cross-pair MLP + log-softmax + masked loss reductions."""
    i = pl.program_id(0)
    j = pl.program_id(1)

    @pl.when(j == 0)
    def _():
        out_ref[...] = jnp.zeros_like(out_ref)

    # First linear layer, factored so concat(a, b) is never materialized.
    ah = _mm(a_ref[...], w1a_ref[...])                     # (ta, 256)
    bh = _mm(b_ref[...], w1b_ref[...]) + b1_ref[...]       # (tb, 256)
    p = ta * tb
    h1 = (ah[:, None, :] + bh[None, :, :]).reshape(p, H1)  # all (a_i, b_j) pairs
    h2 = jnp.maximum(_mm(h1, w2_ref[...]) + b2_ref[...], 0.0)
    h3 = jnp.maximum(_mm(h2, w3_ref[...]) + b3_ref[...], 0.0)
    # Elementwise 2-class head: d = logit1 - logit0.
    d = jnp.sum(h3 * w4d_ref[...], axis=-1, keepdims=True) + b4d_ref[0, 0]

    shift = tb.bit_length() - 1                            # tb is a power of 2
    r = lax.broadcasted_iota(jnp.int32, (p, 1), 0)
    a_idx = i * ta + (r >> shift)
    b_idx = j * tb + (r & (tb - 1))
    valid = jnp.logical_and(a_idx < bs, b_idx < bs)
    diag = jnp.logical_and(valid, a_idx == b_idx)
    off = jnp.logical_and(valid, a_idx != b_idx)

    s0 = jnp.sum(jnp.where(diag, -_softplus(d), 0.0))      # sum log p0, matched
    s1 = jnp.sum(jnp.where(off, -_softplus(-d), 0.0))      # sum log p1, off-diag

    row = lax.broadcasted_iota(jnp.int32, (SUBLANES, LANES), 0)
    lane = lax.broadcasted_iota(jnp.int32, (SUBLANES, LANES), 1)
    upd = (jnp.where(jnp.logical_and(row == 0, lane == 0), s0, 0.0)
           + jnp.where(jnp.logical_and(row == 0, lane == 1), s1, 0.0))
    out_ref[0] += upd


def _cross_bwd_kernel(ct_ref, a_ref, b_ref, w1a_ref, w1b_ref, b1_ref, w2_ref,
                      b2_ref, w3_ref, b3_ref, w4d_ref, b4d_ref,
                      dw1a_ref, dw1b_ref, db1_ref, dw2_ref, db2_ref,
                      dw3_ref, db3_ref, dw4d_ref, db4d_ref,
                      *, bs, ta, tb, fp):
    """Backward of the fused cross loss terms: recompute + manual backprop."""
    i = pl.program_id(0)
    j = pl.program_id(1)

    @pl.when(j == 0)
    def _():
        dw1a_ref[...] = jnp.zeros_like(dw1a_ref)
        dw1b_ref[...] = jnp.zeros_like(dw1b_ref)
        db1_ref[...] = jnp.zeros_like(db1_ref)
        dw2_ref[...] = jnp.zeros_like(dw2_ref)
        db2_ref[...] = jnp.zeros_like(db2_ref)
        dw3_ref[...] = jnp.zeros_like(dw3_ref)
        db3_ref[...] = jnp.zeros_like(db3_ref)
        dw4d_ref[...] = jnp.zeros_like(dw4d_ref)
        db4d_ref[...] = jnp.zeros_like(db4d_ref)

    p = ta * tb
    a16 = a_ref[...].astype(MATMUL_DTYPE)
    b16 = b_ref[...].astype(MATMUL_DTYPE)

    # --- recompute forward activations (cheaper than saving bs^2 x 448 f32) ---
    ah = jnp.dot(a16, w1a_ref[...].astype(MATMUL_DTYPE),
                 preferred_element_type=jnp.float32)
    bh = jnp.dot(b16, w1b_ref[...].astype(MATMUL_DTYPE),
                 preferred_element_type=jnp.float32) + b1_ref[...]
    h1 = (ah[:, None, :] + bh[None, :, :]).reshape(p, H1)
    h1_16 = h1.astype(MATMUL_DTYPE)
    h2 = jnp.maximum(jnp.dot(h1_16, w2_ref[...].astype(MATMUL_DTYPE),
                             preferred_element_type=jnp.float32)
                     + b2_ref[...], 0.0)
    h2_16 = h2.astype(MATMUL_DTYPE)
    h3 = jnp.maximum(jnp.dot(h2_16, w3_ref[...].astype(MATMUL_DTYPE),
                             preferred_element_type=jnp.float32)
                     + b3_ref[...], 0.0)
    d = jnp.sum(h3 * w4d_ref[...], axis=-1, keepdims=True) + b4d_ref[0, 0]
    sig = 1.0 / (1.0 + jnp.exp(-d))

    # --- upstream cotangents of (S0, S1) -> gradient wrt d ---
    shift = tb.bit_length() - 1
    r = lax.broadcasted_iota(jnp.int32, (p, 1), 0)
    a_idx = i * ta + (r >> shift)
    b_idx = j * tb + (r & (tb - 1))
    valid = jnp.logical_and(a_idx < bs, b_idx < bs)
    diag = jnp.logical_and(valid, a_idx == b_idx)
    off = jnp.logical_and(valid, a_idx != b_idx)
    g0 = ct_ref[0, 0]
    g1 = ct_ref[0, 1]
    # d/dd log p0 = -sigmoid(d);  d/dd log p1 = 1 - sigmoid(d)
    g_d = (jnp.where(diag, -g0 * sig, 0.0)
           + jnp.where(off, g1 * (1.0 - sig), 0.0))        # (p, 1)

    # --- head: d = h3 . w4d + b4d ---
    dw4d_ref[0] += jnp.sum(h3 * g_d, axis=0, keepdims=True)           # (1, 64)
    lane1 = lax.broadcasted_iota(jnp.int32, (1, LANES), 1)
    db4d_ref[0] += jnp.where(lane1 == 0, jnp.sum(g_d), 0.0)           # (1, 128)

    g_z3 = jnp.where(h3 > 0.0, g_d * w4d_ref[...], 0.0)               # (p, 64)
    dw3_ref[0] += _mm_tn(h2_16, g_z3)                                 # (128, 64)
    db3_ref[0] += jnp.sum(g_z3, axis=0, keepdims=True)

    g_h2 = _mm_nt(g_z3, w3_ref[...])                                  # (p, 128)
    g_z2 = jnp.where(h2 > 0.0, g_h2, 0.0)
    dw2_ref[0] += _mm_tn(h1_16, g_z2)                                 # (256, 128)
    db2_ref[0] += jnp.sum(g_z2, axis=0, keepdims=True)

    g_h1 = _mm_nt(g_z2, w2_ref[...])                                  # (p, 256)
    db1_ref[0] += jnp.sum(g_h1, axis=0, keepdims=True)

    # dW1a = a_expanded^T @ g_h1, dW1b = b_tiled^T @ g_h1 (pairs built in VMEM).
    a_exp = jnp.broadcast_to(a16[:, None, :], (ta, tb, fp)).reshape(p, fp)
    b_exp = jnp.broadcast_to(b16[None, :, :], (ta, tb, fp)).reshape(p, fp)
    dw1a_ref[0] += _mm_tn(a_exp, g_h1)
    dw1b_ref[0] += _mm_tn(b_exp, g_h1)


def _diag_eval_kernel(a_ref, b_ref, w1a_ref, w1b_ref, b1_ref, w2_ref, b2_ref,
                      w3_ref, b3_ref, w4d_ref, b4d_ref, out_ref, *, bs, tr):
    """Final evaluation: matched pairs only (cheap, O(bs))."""
    t = pl.program_id(0)
    h1 = (_mm(a_ref[...], w1a_ref[...]) + _mm(b_ref[...], w1b_ref[...])
          + b1_ref[...])
    h2 = jnp.maximum(_mm(h1, w2_ref[...]) + b2_ref[...], 0.0)
    h3 = jnp.maximum(_mm(h2, w3_ref[...]) + b3_ref[...], 0.0)
    d = jnp.sum(h3 * w4d_ref[...], axis=-1, keepdims=True) + b4d_ref[0, 0]
    r = t * tr + lax.broadcasted_iota(jnp.int32, (tr, 1), 0)
    s0 = jnp.sum(jnp.where(r < bs, -_softplus(d), 0.0))
    row = lax.broadcasted_iota(jnp.int32, (SUBLANES, LANES), 0)
    lane = lax.broadcasted_iota(jnp.int32, (SUBLANES, LANES), 1)
    out_ref[0] = jnp.where(jnp.logical_and(row == 0, lane == 0), s0, 0.0)


# ----------------------------------------------------------------------------
# pallas_call wrappers
# ----------------------------------------------------------------------------
def _kernel_param_specs(fp):
    """BlockSpecs for the 8 VMEM weights/biases + the SMEM scalar b4d."""
    const2 = lambda *_: (0, 0)   # weights stay VMEM-resident across the grid
    return [
        pl.BlockSpec((fp, H1), const2),   # w1a
        pl.BlockSpec((fp, H1), const2),   # w1b
        pl.BlockSpec((1, H1), const2),    # b1
        pl.BlockSpec((H1, H2), const2),   # w2
        pl.BlockSpec((1, H2), const2),    # b2
        pl.BlockSpec((H2, H3), const2),   # w3
        pl.BlockSpec((1, H3), const2),    # b3
        pl.BlockSpec((1, H3), const2),    # w4d
        pl.BlockSpec(memory_space=pltpu.MemorySpace.SMEM),   # b4d (1,1)
    ]


def _cross_sums_pallas(kp, a_pad, b_pad, bs, ta, tb):
    s, fp = a_pad.shape
    ni, nj = s // ta, s // tb
    p_total = s * s
    cost = pl.CostEstimate(
        flops=2 * p_total * (H1 * H2 + H2 * H3 + H3) + 4 * s * fp * H1,
        transcendentals=2 * p_total,
        bytes_accessed=4 * (2 * s * fp + 2 * fp * H1 + H1 * H2 + H2 * H3
                            + 2 * H3 + ni * SUBLANES * LANES))
    out = pl.pallas_call(
        functools.partial(_cross_fwd_kernel, bs=bs, ta=ta, tb=tb),
        out_shape=jax.ShapeDtypeStruct((ni, SUBLANES, LANES), jnp.float32),
        grid=(ni, nj),
        in_specs=[pl.BlockSpec((ta, fp), lambda i, j: (i, 0)),
                  pl.BlockSpec((tb, fp), lambda i, j: (j, 0))]
                 + _kernel_param_specs(fp),
        out_specs=pl.BlockSpec((1, SUBLANES, LANES), lambda i, j: (i, 0, 0)),
        compiler_params=pltpu.CompilerParams(
            dimension_semantics=("parallel", "arbitrary"),
            vmem_limit_bytes=_VMEM_LIMIT),
        cost_estimate=cost,
    )(a_pad, b_pad, *kp)
    return jnp.sum(out[:, 0, 0]), jnp.sum(out[:, 0, 1])


def _cross_grads_pallas(ct, kp, a_pad, b_pad, bs, ta, tb):
    s, fp = a_pad.shape
    ni, nj = s // ta, s // tb
    grad_shapes = [
        jax.ShapeDtypeStruct((ni, fp, H1), jnp.float32),    # dw1a
        jax.ShapeDtypeStruct((ni, fp, H1), jnp.float32),    # dw1b
        jax.ShapeDtypeStruct((ni, 1, H1), jnp.float32),     # db1
        jax.ShapeDtypeStruct((ni, H1, H2), jnp.float32),    # dw2
        jax.ShapeDtypeStruct((ni, 1, H2), jnp.float32),     # db2
        jax.ShapeDtypeStruct((ni, H2, H3), jnp.float32),    # dw3
        jax.ShapeDtypeStruct((ni, 1, H3), jnp.float32),     # db3
        jax.ShapeDtypeStruct((ni, 1, H3), jnp.float32),     # dw4d
        jax.ShapeDtypeStruct((ni, 1, LANES), jnp.float32),  # db4d (lane 0)
    ]
    grad_specs = [pl.BlockSpec((1,) + sh.shape[1:], lambda i, j: (i, 0, 0))
                  for sh in grad_shapes]
    outs = pl.pallas_call(
        functools.partial(_cross_bwd_kernel, bs=bs, ta=ta, tb=tb, fp=fp),
        out_shape=tuple(grad_shapes),
        grid=(ni, nj),
        in_specs=[pl.BlockSpec(memory_space=pltpu.MemorySpace.SMEM),   # ct (1,2)
                  pl.BlockSpec((ta, fp), lambda i, j: (i, 0)),
                  pl.BlockSpec((tb, fp), lambda i, j: (j, 0))]
                 + _kernel_param_specs(fp),
        out_specs=tuple(grad_specs),
        compiler_params=pltpu.CompilerParams(
            dimension_semantics=("parallel", "arbitrary"),
            vmem_limit_bytes=_VMEM_LIMIT),
    )(ct, a_pad, b_pad, *kp)
    return tuple(g.sum(axis=0) for g in outs)   # reduce per-a-tile partials


def _diag_logp0_sum_pallas(kp, a_pad, b_pad, bs, tr):
    s, fp = a_pad.shape
    nt = s // tr
    out = pl.pallas_call(
        functools.partial(_diag_eval_kernel, bs=bs, tr=tr),
        out_shape=jax.ShapeDtypeStruct((nt, SUBLANES, LANES), jnp.float32),
        grid=(nt,),
        in_specs=[pl.BlockSpec((tr, fp), lambda t: (t, 0)),
                  pl.BlockSpec((tr, fp), lambda t: (t, 0))]
                 + _kernel_param_specs(fp),
        out_specs=pl.BlockSpec((1, SUBLANES, LANES), lambda t: (t, 0, 0)),
        compiler_params=pltpu.CompilerParams(
            dimension_semantics=("parallel",),
            vmem_limit_bytes=_VMEM_LIMIT),
    )(a_pad, b_pad, *kp)
    return jnp.sum(out[:, 0, 0])


# ----------------------------------------------------------------------------
# Differentiable fused cross terms (Pallas fwd + Pallas bwd via custom_vjp)
# ----------------------------------------------------------------------------
def _to_kernel_params(params, fea_dim, fp):
    (w1, b1), (w2, b2), (w3, b3), (w4, b4) = params
    pad_f = ((0, fp - fea_dim), (0, 0))
    w1a = jnp.pad(w1[:fea_dim], pad_f)
    w1b = jnp.pad(w1[fea_dim:], pad_f)
    w4d = (w4[:, 1] - w4[:, 0]).reshape(1, H3)
    b4d = (b4[:, 1] - b4[:, 0]).reshape(1, 1)
    return (w1a, w1b, b1, w2, b2, w3, b3, w4d, b4d)


def _make_cross_terms(bs, fea_dim, fp, ta, tb):
    def primal(params, a_pad, b_pad):
        kp = _to_kernel_params(params, fea_dim, fp)
        return _cross_sums_pallas(kp, a_pad, b_pad, bs, ta, tb)

    def fwd(params, a_pad, b_pad):
        return primal(params, a_pad, b_pad), (params, a_pad, b_pad)

    def bwd(res, cts):
        params, a_pad, b_pad = res
        g0, g1 = cts
        kp = _to_kernel_params(params, fea_dim, fp)
        ct = jnp.stack([g0, g1]).reshape(1, 2).astype(jnp.float32)
        (dw1a, dw1b, db1, dw2, db2, dw3, db3, dw4d, db4d_v) = _cross_grads_pallas(
            ct, kp, a_pad, b_pad, bs, ta, tb)
        dw1 = jnp.concatenate([dw1a[:fea_dim], dw1b[:fea_dim]], axis=0)
        dw4 = jnp.concatenate([-dw4d.reshape(H3, 1), dw4d.reshape(H3, 1)], axis=1)
        db4d = db4d_v[0, 0]
        db4 = jnp.stack([-db4d, db4d]).reshape(1, 2)
        dparams = ((dw1, db1), (dw2, db2), (dw3, db3), (dw4, db4))
        # TODO(synk): gradients wrt a/b are not produced (the reference detaches
        # a and b inside the inner optimization loop, so they are never needed
        # for the Adam step; the returned loss value does not require them).
        return dparams, jnp.zeros_like(a_pad), jnp.zeros_like(b_pad)

    f = jax.custom_vjp(primal)
    f.defvjp(fwd, bwd)
    return f


# ----------------------------------------------------------------------------
# Adam step (plain-JAX glue on tiny parameter tensors)
# ----------------------------------------------------------------------------
def _adam_step(params, grads, m_state, v_state, t):
    leaves_p, treedef = jax.tree_util.tree_flatten(params)
    leaves_g = jax.tree_util.tree_leaves(grads)
    leaves_m = jax.tree_util.tree_leaves(m_state)
    leaves_v = jax.tree_util.tree_leaves(v_state)
    new_p, new_m, new_v = [], [], []
    for pp, g, m, v in zip(leaves_p, leaves_g, leaves_m, leaves_v):
        g = g + _WD * pp                       # weight decay = L2 on the grad
        m = _B1 * m + (1.0 - _B1) * g
        v = _B2 * v + (1.0 - _B2) * (g * g)
        m_hat = m / (1.0 - _B1 ** t)
        v_hat = v / (1.0 - _B2 ** t)
        new_p.append(pp - _LR * m_hat / (jnp.sqrt(v_hat) + _EPS))
        new_m.append(m)
        new_v.append(v)
    unflat = jax.tree_util.tree_unflatten
    return unflat(treedef, new_p), unflat(treedef, new_m), unflat(treedef, new_v)


# ----------------------------------------------------------------------------
# Full H_Discriminator.forward
# ----------------------------------------------------------------------------
def _round_up(x, m):
    return ((x + m - 1) // m) * m


def _pick_tile(bs):
    # power-of-two tile in [8, 64]; 64x64 -> 4096-row pair matmuls per grid
    # step, ~12-20 MiB live in VMEM (fits v7x's 32 MiB scoped default).
    t = 1 << max(3, (max(bs, 2) - 1).bit_length())
    return min(t, 64)


@functools.partial(jax.jit, static_argnames=("iters",))
def h_discriminator_forward(params, a, b, iters=1):
    bs, fea_dim = a.shape
    fp = _round_up(fea_dim, SUBLANES)
    tile = _pick_tile(bs)
    s = _round_up(bs, tile)
    a_pad = jnp.pad(a.astype(jnp.float32), ((0, s - bs), (0, fp - fea_dim)))
    b_pad = jnp.pad(b.astype(jnp.float32), ((0, s - bs), (0, fp - fea_dim)))

    cross_terms = _make_cross_terms(bs, fea_dim, fp, tile, tile)

    def inner_loss(p):
        s0, s1 = cross_terms(p, a_pad, b_pad)
        return -(s0 / bs + math.log(bs - 1) + s1 / bs)

    # Fresh Adam state every call: matches the reference, which constructs a
    # new torch.optim.Adam inside forward().
    m_state = jax.tree_util.tree_map(jnp.zeros_like, params)
    v_state = jax.tree_util.tree_map(jnp.zeros_like, params)
    for t in range(iters):
        grads = jax.grad(inner_loss)(params)
        params, m_state, v_state = _adam_step(params, grads, m_state, v_state,
                                              t + 1)

    # Final evaluation: only matched pairs are needed -> cheap diag kernel.
    kp = _to_kernel_params(params, fea_dim, fp)
    s0_final = _diag_logp0_sum_pallas(kp, a_pad, b_pad, bs, tile)
    return -(s0_final / bs + math.log(bs - 1))


def init_params(key, fea_dim):
    # nn.Linear default init: U(-1/sqrt(fan_in), 1/sqrt(fan_in)) for W and b.
    dims = [(fea_dim * 2, H1), (H1, H2), (H2, H3), (H3, NCLS)]
    params = []
    for din, dout in dims:
        key, kw, kb = jax.random.split(key, 3)
        bound = 1.0 / math.sqrt(din)
        w = jax.random.uniform(kw, (din, dout), jnp.float32, -bound, bound)
        bias = jax.random.uniform(kb, (1, dout), jnp.float32, -bound, bound)
        params.append((w, bias))
    return tuple(params)


# ----------------------------------------------------------------------------
# Pure-JAX references (checking only)
# ----------------------------------------------------------------------------
def _mlp_logits_ref(params, x):
    (w1, b1), (w2, b2), (w3, b3), (w4, b4) = params
    h1 = x @ w1 + b1
    h2 = jnp.maximum(h1 @ w2 + b2, 0.0)
    h3 = jnp.maximum(h2 @ w3 + b3, 0.0)
    return h3 @ w4 + b4


def _cross_terms_mirror(params, a, b):
    """bf16-matched pure-JAX mirror of the fused Pallas kernels."""
    bs, fea_dim = a.shape
    (w1, b1), (w2, b2), (w3, b3), (w4, b4) = params
    w1a, w1b = w1[:fea_dim], w1[fea_dim:]
    w4d = (w4[:, 1] - w4[:, 0]).reshape(1, H3)
    b4d = b4[0, 1] - b4[0, 0]
    ah = _mm(a, w1a)
    bh = _mm(b, w1b) + b1
    h1 = (ah[:, None, :] + bh[None, :, :]).reshape(bs * bs, H1)
    h2 = jnp.maximum(_mm(h1, w2) + b2, 0.0)
    h3 = jnp.maximum(_mm(h2, w3) + b3, 0.0)
    d = (jnp.sum(h3 * w4d, axis=-1) + b4d).reshape(bs, bs)
    eye = jnp.eye(bs, dtype=bool)
    s0 = jnp.sum(jnp.where(eye, -_softplus(d), 0.0))
    s1 = jnp.sum(jnp.where(eye, 0.0, -_softplus(-d)))
    return s0, s1


def h_discriminator_forward_ref(params, a, b, iters=1):
    """Straight f32/XLA port of the PyTorch forward (checking only)."""
    bs, fea_dim = a.shape
    a_e = jnp.repeat(a[:, None, :], bs, axis=1).reshape(bs * bs, fea_dim)
    b_e = jnp.tile(b[None, :, :], (bs, 1, 1)).reshape(bs * bs, fea_dim)

    def loss_fn(p):
        lg = jax.nn.log_softmax(_mlp_logits_ref(p, jnp.concatenate([a, b], 1)), 1)
        lc = jax.nn.log_softmax(
            _mlp_logits_ref(p, jnp.concatenate([a_e, b_e], 1)), 1
        ).reshape(bs, bs, 2)
        off = jnp.sum(lc[:, :, 1]) - jnp.sum(jnp.diagonal(lc[:, :, 1]))
        return -(jnp.sum(lg[:, 0]) / bs + math.log(bs - 1) + off / bs)

    m_state = jax.tree_util.tree_map(jnp.zeros_like, params)
    v_state = jax.tree_util.tree_map(jnp.zeros_like, params)
    p = params
    for t in range(iters):
        g = jax.grad(loss_fn)(p)
        p, m_state, v_state = _adam_step(p, g, m_state, v_state, t + 1)
    lg = jax.nn.log_softmax(_mlp_logits_ref(p, jnp.concatenate([a, b], 1)), 1)
    return -(jnp.sum(lg[:, 0]) / bs + math.log(bs - 1))


if __name__ == "__main__":
    key = jax.random.PRNGKey(0)
    fea_dim, bs = 32, 8
    k_p, k_a, k_b = jax.random.split(key, 3)
    params = init_params(k_p, fea_dim)
    a = jax.random.normal(k_a, (bs, fea_dim), jnp.float32)
    b = jax.random.normal(k_b, (bs, fea_dim), jnp.float32)

    fp = _round_up(fea_dim, SUBLANES)
    tile = _pick_tile(bs)
    s = _round_up(bs, tile)
    a_pad = jnp.pad(a, ((0, s - bs), (0, fp - fea_dim)))
    b_pad = jnp.pad(b, ((0, s - bs), (0, fp - fea_dim)))
    cross_terms = _make_cross_terms(bs, fea_dim, fp, tile, tile)

    # Check 1: fused cross forward kernel vs bf16-matched pure-JAX mirror.
    s0_k, s1_k = jax.block_until_ready(cross_terms(params, a_pad, b_pad))
    s0_r, s1_r = _cross_terms_mirror(params, a, b)
    assert jnp.allclose(s0_k, s0_r, rtol=1e-3, atol=1e-2), (s0_k, s0_r)
    assert jnp.allclose(s1_k, s1_r, rtol=1e-3, atol=1e-2), (s1_k, s1_r)

    # Check 2: Pallas backward kernel vs autodiff of the bf16-matched mirror.
    def loss_pallas(p):
        s0, s1 = cross_terms(p, a_pad, b_pad)
        return -(s0 / bs + math.log(bs - 1) + s1 / bs)

    def loss_mirror(p):
        s0, s1 = _cross_terms_mirror(p, a, b)
        return -(s0 / bs + math.log(bs - 1) + s1 / bs)

    g_k = jax.block_until_ready(jax.grad(loss_pallas)(params))
    g_r = jax.grad(loss_mirror)(params)
    for gk, gr in zip(jax.tree_util.tree_leaves(g_k),
                      jax.tree_util.tree_leaves(g_r)):
        err = jnp.linalg.norm(gk - gr) / (jnp.linalg.norm(gr) + 1e-6)
        assert float(err) < 0.1, (gk.shape, float(err))

    # Check 3: end-to-end forward (1 inner Adam step) vs f32 reference port.
    loss = jax.block_until_ready(h_discriminator_forward(params, a, b, iters=1))
    loss_ref = h_discriminator_forward_ref(params, a, b, iters=1)
    assert jnp.isfinite(loss)
    assert abs(float(loss) - float(loss_ref)) < 5e-2, (float(loss),
                                                       float(loss_ref))

    print("KERNEL_OK")
</pallas_src>

<mosaic_0001>
module attributes {stable_mosaic.version = 11 : i64} {
  func.func @_cross_fwd_kernel(%arg0: i32, %arg1: i32, %arg2: memref<8x32xf32, #tpu.memory_space<vmem>>, %arg3: memref<8x32xf32, #tpu.memory_space<vmem>>, %arg4: memref<32x256xf32, #tpu.memory_space<vmem>>, %arg5: memref<32x256xf32, #tpu.memory_space<vmem>>, %arg6: memref<1x256xf32, #tpu.memory_space<vmem>>, %arg7: memref<256x128xf32, #tpu.memory_space<vmem>>, %arg8: memref<1x128xf32, #tpu.memory_space<vmem>>, %arg9: memref<128x64xf32, #tpu.memory_space<vmem>>, %arg10: memref<1x64xf32, #tpu.memory_space<vmem>>, %arg11: memref<1x64xf32, #tpu.memory_space<vmem>>, %arg12: memref<1x1xf32, #tpu.memory_space<smem>>, %arg13: memref<1x8x128xf32, #tpu.memory_space<vmem>>) attributes {dimension_semantics = [#tpu.dimension_semantics<parallel>, #tpu.dimension_semantics<arbitrary>], iteration_bounds = array<i64: 1, 1>, scalar_prefetch = 0 : i64, scratch_operands = 0 : i64, tpu.core_type = #tpu.core_type<tc>, window_params = [{transform_indices = @transform_0, window_bounds = array<i64: 8, 32>}, {transform_indices = @transform_1, window_bounds = array<i64: 8, 32>}, {pipeline_mode = #tpu.pipeline_mode<synchronous>, transform_indices = @transform_2, window_bounds = array<i64: 32, 256>}, {pipeline_mode = #tpu.pipeline_mode<synchronous>, transform_indices = @transform_3, window_bounds = array<i64: 32, 256>}, {pipeline_mode = #tpu.pipeline_mode<synchronous>, transform_indices = @transform_4, window_bounds = array<i64: 1, 256>}, {pipeline_mode = #tpu.pipeline_mode<synchronous>, transform_indices = @transform_5, window_bounds = array<i64: 256, 128>}, {pipeline_mode = #tpu.pipeline_mode<synchronous>, transform_indices = @transform_6, window_bounds = array<i64: 1, 128>}, {pipeline_mode = #tpu.pipeline_mode<synchronous>, transform_indices = @transform_7, window_bounds = array<i64: 128, 64>}, {pipeline_mode = #tpu.pipeline_mode<synchronous>, transform_indices = @transform_8, window_bounds = array<i64: 1, 64>}, {pipeline_mode = #tpu.pipeline_mode<synchronous>, transform_indices = @transform_9, window_bounds = array<i64: 1, 64>}, {transform_indices = @transform_10, window_bounds = array<i64: 1, 1>}, {transform_indices = @transform_11, window_bounds = array<i64: 1, 8, 128>}]} {
    %c0_i32 = arith.constant 0 : i32
    %0 = arith.cmpi eq, %arg1, %c0_i32 : i32
    %1 = arith.extui %0 : i1 to i32
    %c0_i32_0 = arith.constant 0 : i32
    %2 = arith.cmpi ne, %1, %c0_i32_0 : i32
    scf.if %2 {
      %cst_55 = arith.constant 0.000000e+00 : f32
      %131 = vector.broadcast %cst_55 : f32 to vector<1x8x128xf32>
      %c0_56 = arith.constant 0 : index
      %c0_57 = arith.constant 0 : index
      %c0_58 = arith.constant 0 : index
      %132 = vector.load %arg13[%c0_56, %c0_57, %c0_58] : memref<1x8x128xf32, #tpu.memory_space<vmem>>, vector<1x8x128xf32>
      tpu.vector_store %arg13[%c0_56, %c0_57, %c0_58], %131 {strides = array<i32>} : memref<1x8x128xf32, #tpu.memory_space<vmem>>, vector<1x8x128xf32>,
    } else {
    }
    %c0 = arith.constant 0 : index
    %c0_1 = arith.constant 0 : index
    %3 = vector.load %arg2[%c0, %c0_1] : memref<8x32xf32, #tpu.memory_space<vmem>>, vector<8x32xf32>
    %c0_2 = arith.constant 0 : index
    %c0_3 = arith.constant 0 : index
    %4 = vector.load %arg4[%c0_2, %c0_3] : memref<32x256xf32, #tpu.memory_space<vmem>>, vector<32x256xf32>
    %5 = arith.truncf %3 : vector<8x32xf32> to vector<8x32xbf16>
    %6 = arith.truncf %4 : vector<32x256xf32> to vector<32x256xbf16>
    %cst = arith.constant dense<0.000000e+00> : vector<8x256xf32>
    %7 = tpu.matmul %5, %6, %cst {dimension_numbers = #tpu.dot_dimension_numbers<[1], [0], [0], [1], [0, 0, 1, 1], [], []>} : vector<8x32xbf16>, vector<32x256xbf16>, vector<8x256xf32> -> vector<8x256xf32>
    %c0_4 = arith.constant 0 : index
    %c0_5 = arith.constant 0 : index
    %8 = vector.load %arg3[%c0_4, %c0_5] : memref<8x32xf32, #tpu.memory_space<vmem>>, vector<8x32xf32>
    %c0_6 = arith.constant 0 : index
    %c0_7 = arith.constant 0 : index
    %9 = vector.load %arg5[%c0_6, %c0_7] : memref<32x256xf32, #tpu.memory_space<vmem>>, vector<32x256xf32>
    %10 = arith.truncf %8 : vector<8x32xf32> to vector<8x32xbf16>
    %11 = arith.truncf %9 : vector<32x256xf32> to vector<32x256xbf16>
    %cst_8 = arith.constant dense<0.000000e+00> : vector<8x256xf32>
    %12 = tpu.matmul %10, %11, %cst_8 {dimension_numbers = #tpu.dot_dimension_numbers<[1], [0], [0], [1], [0, 0, 1, 1], [], []>} : vector<8x32xbf16>, vector<32x256xbf16>, vector<8x256xf32> -> vector<8x256xf32>
    %c0_9 = arith.constant 0 : index
    %c0_10 = arith.constant 0 : index
    %13 = vector.load %arg6[%c0_9, %c0_10] : memref<1x256xf32, #tpu.memory_space<vmem>>, vector<1x256xf32>
    %14 = vector.broadcast %13 : vector<1x256xf32> to vector<8x256xf32>
    %15 = arith.addf %12, %14 : vector<8x256xf32>
    %16 = vector.shape_cast %7 : vector<8x256xf32> to vector<8x1x256xf32>
    %17 = vector.shape_cast %15 : vector<8x256xf32> to vector<1x8x256xf32>
    %18 = vector.broadcast %16 : vector<8x1x256xf32> to vector<8x8x256xf32>
    %19 = vector.broadcast %17 : vector<1x8x256xf32> to vector<8x8x256xf32>
    %20 = arith.addf %18, %19 : vector<8x8x256xf32>
    %21 = vector.shape_cast %20 : vector<8x8x256xf32> to vector<64x256xf32>
    %c0_11 = arith.constant 0 : index
    %c0_12 = arith.constant 0 : index
    %22 = vector.load %arg7[%c0_11, %c0_12] : memref<256x128xf32, #tpu.memory_space<vmem>>, vector<256x128xf32>
    %23 = arith.truncf %21 : vector<64x256xf32> to vector<64x256xbf16>
    %24 = arith.truncf %22 : vector<256x128xf32> to vector<256x128xbf16>
    %cst_13 = arith.constant dense<0.000000e+00> : vector<64x128xf32>
    %25 = tpu.matmul %23, %24, %cst_13 {dimension_numbers = #tpu.dot_dimension_numbers<[1], [0], [0], [1], [0, 0, 1, 1], [], []>} : vector<64x256xbf16>, vector<256x128xbf16>, vector<64x128xf32> -> vector<64x128xf32>
    %c0_14 = arith.constant 0 : index
    %c0_15 = arith.constant 0 : index
    %26 = vector.load %arg8[%c0_14, %c0_15] : memref<1x128xf32, #tpu.memory_space<vmem>>, vector<1x128xf32>
    %27 = vector.broadcast %26 : vector<1x128xf32> to vector<64x128xf32>
    %28 = arith.addf %25, %27 : vector<64x128xf32>
    %cst_16 = arith.constant 0.000000e+00 : f32
    %29 = vector.broadcast %cst_16 : f32 to vector<64x128xf32>
    %30 = arith.maximumf %28, %29 : vector<64x128xf32>
    %c0_17 = arith.constant 0 : index
    %c0_18 = arith.constant 0 : index
    %31 = vector.load %arg9[%c0_17, %c0_18] : memref<128x64xf32, #tpu.memory_space<vmem>>, vector<128x64xf32>
    %32 = arith.truncf %30 : vector<64x128xf32> to vector<64x128xbf16>
    %33 = arith.truncf %31 : vector<128x64xf32> to vector<128x64xbf16>
    %cst_19 = arith.constant dense<0.000000e+00> : vector<64x64xf32>
    %34 = tpu.matmul %32, %33, %cst_19 {dimension_numbers = #tpu.dot_dimension_numbers<[1], [0], [0], [1], [0, 0, 1, 1], [], []>} : vector<64x128xbf16>, vector<128x64xbf16>, vector<64x64xf32> -> vector<64x64xf32>
    %c0_20 = arith.constant 0 : index
    %c0_21 = arith.constant 0 : index
    %35 = vector.load %arg10[%c0_20, %c0_21] : memref<1x64xf32, #tpu.memory_space<vmem>>, vector<1x64xf32>
    %36 = vector.broadcast %35 : vector<1x64xf32> to vector<64x64xf32>
    %37 = arith.addf %34, %36 : vector<64x64xf32>
    %cst_22 = arith.constant 0.000000e+00 : f32
    %38 = vector.broadcast %cst_22 : f32 to vector<64x64xf32>
    %39 = arith.maximumf %37, %38 : vector<64x64xf32>
    %c0_23 = arith.constant 0 : index
    %c0_24 = arith.constant 0 : index
    %40 = vector.load %arg11[%c0_23, %c0_24] : memref<1x64xf32, #tpu.memory_space<vmem>>, vector<1x64xf32>
    %41 = vector.broadcast %40 : vector<1x64xf32> to vector<64x64xf32>
    %42 = arith.mulf %39, %41 : vector<64x64xf32>
    %cst_25 = arith.constant dense<0.000000e+00> : vector<64xf32>
    %43 = vector.multi_reduction <add>, %42, %cst_25 [1] : vector<64x64xf32> to vector<64xf32>
    %44 = vector.shape_cast %43 : vector<64xf32> to vector<64x1xf32>
    %c0_26 = arith.constant 0 : index
    %c0_27 = arith.constant 0 : index
    %45 = memref.load %arg12[%c0_26, %c0_27] : memref<1x1xf32, #tpu.memory_space<smem>>
    %46 = vector.broadcast %45 : f32 to vector<64x1xf32>
    %47 = arith.addf %44, %46 : vector<64x1xf32>
    %48 = tpu.iota {dimensions = array<i32: 0>} : vector<64x1xi32>
    %c8_i32 = arith.constant 8 : i32
    %49 = arith.muli %arg0, %c8_i32 : i32
    %c3_i32 = arith.constant 3 : i32
    %50 = vector.broadcast %c3_i32 : i32 to vector<64x1xi32>
    %51 = arith.shrsi %48, %50 : vector<64x1xi32>
    %52 = vector.broadcast %49 : i32 to vector<64x1xi32>
    %53 = arith.addi %52, %51 : vector<64x1xi32>
    %c8_i32_28 = arith.constant 8 : i32
    %54 = arith.muli %arg1, %c8_i32_28 : i32
    %c7_i32 = arith.constant 7 : i32
    %55 = vector.broadcast %c7_i32 : i32 to vector<64x1xi32>
    %56 = arith.andi %48, %55 : vector<64x1xi32>
    %57 = vector.broadcast %54 : i32 to vector<64x1xi32>
    %58 = arith.addi %57, %56 : vector<64x1xi32>
    %c8_i32_29 = arith.constant 8 : i32
    %59 = vector.broadcast %c8_i32_29 : i32 to vector<64x1xi32>
    %60 = arith.cmpi slt, %53, %59 : vector<64x1xi32>
    %c8_i32_30 = arith.constant 8 : i32
    %61 = vector.broadcast %c8_i32_30 : i32 to vector<64x1xi32>
    %62 = arith.cmpi slt, %58, %61 : vector<64x1xi32>
    %63 = arith.andi %60, %62 : vector<64x1xi1>
    %64 = arith.cmpi eq, %53, %58 : vector<64x1xi32>
    %65 = arith.andi %63, %64 : vector<64x1xi1>
    %66 = arith.cmpi ne, %53, %58 : vector<64x1xi32>
    %67 = arith.andi %63, %66 : vector<64x1xi1>
    %cst_31 = arith.constant 0.000000e+00 : f32
    %68 = vector.broadcast %cst_31 : f32 to vector<64x1xf32>
    %69 = arith.maximumf %47, %68 : vector<64x1xf32>
    %70 = math.absf %47 : vector<64x1xf32>
    %cst_32 = arith.constant 0.000000e+00 : f32
    %71 = vector.broadcast %cst_32 : f32 to vector<64x1xf32>
    %72 = arith.subf %71, %70 : vector<64x1xf32>
    %73 = math.exp %72 : vector<64x1xf32>
    %cst_33 = arith.constant 1.000000e+00 : f32
    %74 = vector.broadcast %cst_33 : f32 to vector<64x1xf32>
    %75 = arith.addf %74, %73 : vector<64x1xf32>
    %76 = math.log %75 : vector<64x1xf32>
    %77 = arith.addf %69, %76 : vector<64x1xf32>
    %cst_34 = arith.constant 0.000000e+00 : f32
    %78 = vector.broadcast %cst_34 : f32 to vector<64x1xf32>
    %79 = arith.subf %78, %77 : vector<64x1xf32>
    %cst_35 = arith.constant 0.000000e+00 : f32
    %80 = vector.broadcast %cst_35 : f32 to vector<64x1xf32>
    %81 = arith.select %65, %79, %80 : vector<64x1xi1>, vector<64x1xf32>
    %82 = vector.shape_cast %81 : vector<64x1xf32> to vector<1x64x1xf32>
    %cst_36 = arith.constant dense<0.000000e+00> : vector<1xf32>
    %83 = vector.multi_reduction <add>, %82, %cst_36 [1, 2] : vector<1x64x1xf32> to vector<1xf32>
    %84 = vector.shape_cast %83 : vector<1xf32> to vector<1x1x1xf32>
    %85 = vector.extract %84[0, 0, 0] : f32 from vector<1x1x1xf32>
    %cst_37 = arith.constant 0.000000e+00 : f32
    %86 = vector.broadcast %cst_37 : f32 to vector<64x1xf32>
    %87 = arith.subf %86, %47 : vector<64x1xf32>
    %cst_38 = arith.constant 0.000000e+00 : f32
    %88 = vector.broadcast %cst_38 : f32 to vector<64x1xf32>
    %89 = arith.maximumf %87, %88 : vector<64x1xf32>
    %90 = math.absf %87 : vector<64x1xf32>
    %cst_39 = arith.constant 0.000000e+00 : f32
    %91 = vector.broadcast %cst_39 : f32 to vector<64x1xf32>
    %92 = arith.subf %91, %90 : vector<64x1xf32>
    %93 = math.exp %92 : vector<64x1xf32>
    %cst_40 = arith.constant 1.000000e+00 : f32
    %94 = vector.broadcast %cst_40 : f32 to vector<64x1xf32>
    %95 = arith.addf %94, %93 : vector<64x1xf32>
    %96 = math.log %95 : vector<64x1xf32>
    %97 = arith.addf %89, %96 : vector<64x1xf32>
    %cst_41 = arith.constant 0.000000e+00 : f32
    %98 = vector.broadcast %cst_41 : f32 to vector<64x1xf32>
    %99 = arith.subf %98, %97 : vector<64x1xf32>
    %cst_42 = arith.constant 0.000000e+00 : f32
    %100 = vector.broadcast %cst_42 : f32 to vector<64x1xf32>
    %101 = arith.select %67, %99, %100 : vector<64x1xi1>, vector<64x1xf32>
    %102 = vector.shape_cast %101 : vector<64x1xf32> to vector<1x64x1xf32>
    %cst_43 = arith.constant dense<0.000000e+00> : vector<1xf32>
    %103 = vector.multi_reduction <add>, %102, %cst_43 [1, 2] : vector<1x64x1xf32> to vector<1xf32>
    %104 = vector.shape_cast %103 : vector<1xf32> to vector<1x1x1xf32>
    %105 = vector.extract %104[0, 0, 0] : f32 from vector<1x1x1xf32>
    %106 = tpu.iota {dimensions = array<i32: 0>} : vector<8x128xi32>
    %107 = tpu.iota {dimensions = array<i32: 1>} : vector<8x128xi32>
    %c0_i32_44 = arith.constant 0 : i32
    %108 = vector.broadcast %c0_i32_44 : i32 to vector<8x128xi32>
    %109 = arith.cmpi eq, %106, %108 : vector<8x128xi32>
    %c0_i32_45 = arith.constant 0 : i32
    %110 = vector.broadcast %c0_i32_45 : i32 to vector<8x128xi32>
    %111 = arith.cmpi eq, %107, %110 : vector<8x128xi32>
    %112 = arith.andi %109, %111 : vector<8x128xi1>
    %cst_46 = arith.constant 0.000000e+00 : f32
    %113 = vector.broadcast %85 : f32 to vector<8x128xf32>
    %114 = vector.broadcast %cst_46 : f32 to vector<8x128xf32>
    %115 = arith.select %112, %113, %114 : vector<8x128xi1>, vector<8x128xf32>
    %c0_i32_47 = arith.constant 0 : i32
    %116 = vector.broadcast %c0_i32_47 : i32 to vector<8x128xi32>
    %117 = arith.cmpi eq, %106, %116 : vector<8x128xi32>
    %c1_i32 = arith.constant 1 : i32
    %118 = vector.broadcast %c1_i32 : i32 to vector<8x128xi32>
    %119 = arith.cmpi eq, %107, %118 : vector<8x128xi32>
    %120 = arith.andi %117, %119 : vector<8x128xi1>
    %cst_48 = arith.constant 0.000000e+00 : f32
    %121 = vector.broadcast %105 : f32 to vector<8x128xf32>
    %122 = vector.broadcast %cst_48 : f32 to vector<8x128xf32>
    %123 = arith.select %120, %121, %122 : vector<8x128xi1>, vector<8x128xf32>
    %124 = arith.addf %115, %123 : vector<8x128xf32>
    %c0_49 = arith.constant 0 : index
    %c0_50 = arith.constant 0 : index
    %c0_51 = arith.constant 0 : index
    %125 = vector.load %arg13[%c0_49, %c0_50, %c0_51] : memref<1x8x128xf32, #tpu.memory_space<vmem>>, vector<1x8x128xf32>
    %126 = vector.shape_cast %125 : vector<1x8x128xf32> to vector<8x128xf32>
    %127 = arith.addf %126, %124 : vector<8x128xf32>
    %c0_52 = arith.constant 0 : index
    %c0_53 = arith.constant 0 : index
    %c0_54 = arith.constant 0 : index
    %128 = vector.load %arg13[%c0_52, %c0_53, %c0_54] : memref<1x8x128xf32, #tpu.memory_space<vmem>>, vector<1x8x128xf32>
    %129 = vector.shape_cast %128 : vector<1x8x128xf32> to vector<8x128xf32>
    %130 = vector.shape_cast %127 : vector<8x128xf32> to vector<1x8x128xf32>
    tpu.vector_store %arg13[%c0_52, %c0_53, %c0_54], %130 {strides = array<i32>} : memref<1x8x128xf32, #tpu.memory_space<vmem>>, vector<1x8x128xf32>,
    return
  }
  func.func @transform_0(%arg0: i32, %arg1: i32) -> (i32, i32) {
    %c0_i32 = arith.constant 0 : i32
    %c0_i32_0 = arith.constant 0 : i32
    return %arg0, %c0_i32 : i32, i32
  }
  func.func @transform_1(%arg0: i32, %arg1: i32) -> (i32, i32) {
    %c0_i32 = arith.constant 0 : i32
    %c0_i32_0 = arith.constant 0 : i32
    return %arg1, %c0_i32 : i32, i32
  }
  func.func @transform_2(%arg0: i32, %arg1: i32) -> (i32, i32) {
    %c0_i32 = arith.constant 0 : i32
    %c0_i32_0 = arith.constant 0 : i32
    %c0_i32_1 = arith.constant 0 : i32
    return %c0_i32, %c0_i32_0 : i32, i32
  }
  func.func @transform_3(%arg0: i32, %arg1: i32) -> (i32, i32) {
    %c0_i32 = arith.constant 0 : i32
    %c0_i32_0 = arith.constant 0 : i32
    %c0_i32_1 = arith.constant 0 : i32
    return %c0_i32, %c0_i32_0 : i32, i32
  }
  func.func @transform_4(%arg0: i32, %arg1: i32) -> (i32, i32) {
    %c0_i32 = arith.constant 0 : i32
    %c0_i32_0 = arith.constant 0 : i32
    %c0_i32_1 = arith.constant 0 : i32
    return %c0_i32, %c0_i32_0 : i32, i32
  }
  func.func @transform_5(%arg0: i32, %arg1: i32) -> (i32, i32) {
    %c0_i32 = arith.constant 0 : i32
    %c0_i32_0 = arith.constant 0 : i32
    %c0_i32_1 = arith.constant 0 : i32
    return %c0_i32, %c0_i32_0 : i32, i32
  }
  func.func @transform_6(%arg0: i32, %arg1: i32) -> (i32, i32) {
    %c0_i32 = arith.constant 0 : i32
    %c0_i32_0 = arith.constant 0 : i32
    %c0_i32_1 = arith.constant 0 : i32
    return %c0_i32, %c0_i32_0 : i32, i32
  }
  func.func @transform_7(%arg0: i32, %arg1: i32) -> (i32, i32) {
    %c0_i32 = arith.constant 0 : i32
    %c0_i32_0 = arith.constant 0 : i32
    %c0_i32_1 = arith.constant 0 : i32
    return %c0_i32, %c0_i32_0 : i32, i32
  }
  func.func @transform_8(%arg0: i32, %arg1: i32) -> (i32, i32) {
    %c0_i32 = arith.constant 0 : i32
    %c0_i32_0 = arith.constant 0 : i32
    %c0_i32_1 = arith.constant 0 : i32
    return %c0_i32, %c0_i32_0 : i32, i32
  }
  func.func @transform_9(%arg0: i32, %arg1: i32) -> (i32, i32) {
    %c0_i32 = arith.constant 0 : i32
    %c0_i32_0 = arith.constant 0 : i32
    %c0_i32_1 = arith.constant 0 : i32
    return %c0_i32, %c0_i32_0 : i32, i32
  }
  func.func @transform_10(%arg0: i32, %arg1: i32) -> (i32, i32) {
    %c0_i32 = arith.constant 0 : i32
    %c0_i32_0 = arith.constant 0 : i32
    %c0_i32_1 = arith.constant 0 : i32
    return %c0_i32, %c0_i32_0 : i32, i32
  }
  func.func @transform_11(%arg0: i32, %arg1: i32) -> (i32, i32, i32) {
    %c0_i32 = arith.constant 0 : i32
    %c0_i32_0 = arith.constant 0 : i32
    %c0_i32_1 = arith.constant 0 : i32
    return %arg0, %c0_i32, %c0_i32_0 : i32, i32, i32
  }
}

</mosaic_0001>

<bundles_post_ra>
// kernel: tpu_custom_call.1
= control target key start
LH: loop header
LB: loop body
LE: loop exit
PB: predicated region body
PF: predicated region fallthrough
CT: control target
= control target key end

     0   :  { %17 = vsyncpa [#allocation4], 0  ;;  %s1548_s0 = inlined_call_operand.vmem [shape: f32[8,32], index: 0, kind: input, shape index: {}]   ;;  %s1549_s1 = inlined_call_operand.vmem [shape: f32[8,32], index: 1, kind: input, shape index: {}]   ;;  %s1550_s2 = inlined_call_operand.vmem [shape: f32[32,256], index: 2, kind: input, shape index: {}]   ;;  %s1551_s3 = inlined_call_operand.vmem [shape: f32[32,256], index: 3, kind: input, shape index: {}]   ;;  %s1552_s4 = inlined_call_operand.vmem [shape: f32[1,256], index: 4, kind: input, shape index: {}]   ;;  %s1553_s5 = inlined_call_operand.hbm [shape: f32[256,128], index: 5, kind: input, shape index: {}]   ;;  %s1554_s6 = inlined_call_operand.vmem [shape: f32[1,128], index: 6, kind: input, shape index: {}]   ;;  %s1555_s7 = inlined_call_operand.vmem [shape: f32[128,64], index: 7, kind: input, shape index: {}]   ;;  %s1556_s8 = inlined_call_operand.vmem [shape: f32[1,64], index: 8, kind: input, shape index: {}]   ;;  %s1557_s9 = inlined_call_operand.vmem [shape: f32[1,64], index: 9, kind: input, shape index: {}]   ;;  %s1558_s10 = inlined_call_operand.<no memory space> [shape: f32[1,1], index: 10, kind: input, shape index: {}]   ;;  %s1559_s11 = inlined_call_operand.hbm [shape: f32[1,8,128], index: 11, kind: output, shape index: {}]  }
   0x1   :  { %18 = vsyncpa [#allocation5], 0  ;;  %s33_s19 = sshll.u32 %s1553_s5, 4  ;;  %s977_s20 = smov [#allocation3]   ;;  %s34_s19 = int_to_ptr.hbm [resolvable:$true] %s33_s19 }
   0x2   :  { %s35_s21 = sshll.u32 %s977_s20, 4  ;;  %s978_s22 = smov 128   ;;  %s36_s21 = int_to_ptr.vmem [resolvable:$true] %s35_s21 }
   0x3   :  { %s979_s23 = smov 8  }
   0x4   :  { %41 = dma.hbm_to_vmem [thread:$0]  %s34_s19, 4096, %s36_s21, [#allocation4], %s978_s22, %s978_s22, %s979_s23  }
   0x5   :  { %973 = dma.done.wait [#allocation4], 4096  }
   0x6   :  { %974 = vsyncadd [#allocation4], 4294963200  ;;  %v67_v0 = vld [vmem:[%s1550_s2 + $0x20] sm:$0xff]  ;;  %v69_v1 = vld [vmem:[%s1550_s2 + $0x30] sm:$0xff]  ;;  %vm76_vm0 = vcmask 261120   ;;  %vm158_vm1 = vcmask 1040384  }
   0x7   :  { %v63_v2 = vld [vmem:[%s1550_s2] sm:$0xff]  ;;  %v74_v3 = vpack.c.bf16 %v69_v1, %v67_v0  ;;  %v65_v4 = vld [vmem:[%s1550_s2 + $0x10] sm:$0xff]  ;;  %v68_v5 = vld [vmem:[%s1550_s2 + $0x28] sm:$0xff]  ;;  %vm160_vm2 = vcmask 1041409   ;;  %vm163_vm3 = vcmask 1042434   ;;  %vm166_vm4 = vcmask 1043459  }
   0x8   :  { %v70_v6 = vld [vmem:[%s1550_s2 + $0x38] sm:$0xff]  ;;  %v112_v7 = vld [vmem:[%s1551_s3 + $0x28] sm:$0xff]  ;;  %v72_v9 = vpack.c.bf16 %v65_v4, %v63_v2  ;;  %v62_v10 = vld [vmem:[%s1548_s0] sm:$0xff]  ;;  %vm169_vm5 = vcmask 1044484   ;;  %vm172_vm6 = vcmask 1045509   ;;  %vm175_vm7 = vcmask 1046534  }
   0x9   :  { %v114_v8 = vld [vmem:[%s1551_s3 + $0x38] sm:$0xff]  ;;  %86 = vmatpush.bf16.msra.mxu0 %v74_v3  ;;  %v108_v12 = vld [vmem:[%s1551_s3 + $0x8] sm:$0xff]  ;;  %v75_v13 = vpack.c.bf16 %v70_v6, %v68_v5  ;;  %v106_v18 = vld [vmem:[%s1549_s1] sm:$0xff]  ;;  %v71_v21 = vpack.c.bf16 %v62_v10, %v62_v10  ;;  %vm178_vm8 = vcmask 1046528   ;;  %vm436_vm9 = vcmask 523264   ;;  %s980_s29 = smov [#allocation6]  }
   0xa   :  { %v119_v11 = vpack.c.bf16 %v114_v8, %v112_v7  ;;  %v64_v14 = vld [vmem:[%s1550_s2 + $0x8] sm:$0xff]  ;;  %v66_v15 = vld [vmem:[%s1550_s2 + $0x18] sm:$0xff]  ;;  %v111_v19 = vld [vmem:[%s1551_s3 + $0x20] sm:$0xff]  ;;  %v115_v23 = vpack.c.bf16 %v106_v18, %v106_v18  ;;  %vm660_vm14 = vcmask 7168   ;;  %s825_s0 = sshll.u32 %s980_s29, 4  ;;  %s827_s12 = sshll.u32 %s1559_s11, 4  ;;  %s826_s0 = int_to_ptr.vmem [resolvable:$true] %s825_s0  ;;  %s828_s12 = int_to_ptr.hbm [resolvable:$true] %s827_s12 }
   0xb   :  { %v110_v16 = vld [vmem:[%s1551_s3 + $0x18] sm:$0xff]  ;;  %v113_v20 = vld [vmem:[%s1551_s3 + $0x30] sm:$0xff]  ;;  %v73_v22 = vpack.c.bf16 %v66_v15, %v64_v14  ;;  %v107_v25 = vld [vmem:[%s1551_s3] sm:$0xff] }
   0xc   :  { %148 = vmatpush.bf16.msra.mxu3 %v119_v11  ;;  %v117_v17 = vpack.c.bf16 %v110_v16, %v108_v12  ;;  %v118_v24 = vpack.c.bf16 %v113_v20, %v111_v19  ;;  %v109_v26 = vld [vmem:[%s1551_s3 + $0x10] sm:$0xff]  ;;  %v260_v28 = vld [vmem:[#allocation3 + $0xf8] sm:$0xff]  ;;  %v257_v31 = vld [vmem:[#allocation3 + $0xe0] sm:$0xff] }
   0xd   :  { %87 = vmatpush.bf16.msra.mxu0 %v72_v9  ;;  %v259_v27 = vld [vmem:[#allocation3 + $0xf0] sm:$0xff]  ;;  %v116_v30 = vpack.c.bf16 %v109_v26, %v107_v25  ;;  %v258_v32 = vld [vmem:[#allocation3 + $0xe8] sm:$0xff]  ;;  %v256_v35 = vld [vmem:[#allocation3 + $0xd8] sm:$0xff] }
   0xe   :  { %v284_v29 = vpack.c.bf16 %v260_v28, %v259_v27  ;;  %v283_v33 = vpack.c.bf16 %v258_v32, %v257_v31  ;;  %v255_v34 = vld [vmem:[#allocation3 + $0xd0] sm:$0xff]  ;;  %v244_v38 = vld [vmem:[#allocation3 + $0x78] sm:$0xff]  ;;  %v253_v40 = vld [vmem:[#allocation3 + $0xc0] sm:$0xff] }
   0xf   :  { %v282_v36 = vpack.c.bf16 %v256_v35, %v255_v34  ;;  %v243_v37 = vld [vmem:[#allocation3 + $0x70] sm:$0xff]  ;;  %v254_v41 = vld [vmem:[#allocation3 + $0xc8] sm:$0xff]  ;;  %v241_v43 = vld [vmem:[#allocation3 + $0x60] sm:$0xff] }
  0x10   :  { %149 = vmatpush.bf16.msra.mxu3 %v117_v17  ;;  %837 = vmatmul.msk.bf16.vlgmr.msra.gmra.mxu0 %vm76_vm0, %v71_v21  ;;  %v276_v39 = vpack.c.bf16 %v244_v38, %v243_v37  ;;  %v281_v42 = vpack.c.bf16 %v254_v41, %v253_v40  ;;  %v242_v44 = vld [vmem:[#allocation3 + $0x68] sm:$0xff]  ;;  %v251_v45 = vld [vmem:[#allocation3 + $0xb0] sm:$0xff]  ;;  %v252_v47 = vld [vmem:[#allocation3 + $0xb8] sm:$0xff] }
  0x11   :  { %99 = vmatpush.bf16.msrb.mxu0 %v75_v13  ;;  %318 = vmatpush.bf16.msra.mxu1 %v284_v29  ;;  %v275_v46 = vpack.c.bf16 %v242_v44, %v241_v43  ;;  %v280_v48 = vpack.c.bf16 %v252_v47, %v251_v45  ;;  %v239_v49 = vld [vmem:[#allocation3 + $0x50] sm:$0xff]  ;;  %v240_v50 = vld [vmem:[#allocation3 + $0x58] sm:$0xff]  ;;  %v249_v52 = vld [vmem:[#allocation3 + $0xa0] sm:$0xff] }
  0x12   :  { %v274_v51 = vpack.c.bf16 %v240_v50, %v239_v49  ;;  %v250_v53 = vld [vmem:[#allocation3 + $0xa8] sm:$0xff]  ;;  %v237_v55 = vld [vmem:[#allocation3 + $0x40] sm:$0xff]  ;;  %v247_v58 = vld [vmem:[#allocation3 + $0x90] sm:$0xff] }
  0x13   :  { %840 = vmatmul.msk.bf16.vlgmr.msra.gmra.mxu3 %vm76_vm0, %v115_v23  ;;  %v279_v54 = vpack.c.bf16 %v250_v53, %v249_v52  ;;  %v238_v56 = vld [vmem:[#allocation3 + $0x48] sm:$0xff]  ;;  %v248_v59 = vld [vmem:[#allocation3 + $0x98] sm:$0xff]  ;;  %v235_v61 = vld [vmem:[#allocation3 + $0x30] sm:$0xff] }
  0x14   :  { %841 = vmatpush.bf16.msrb.mxu3 %v276_v39  ;;  %v273_v57 = vpack.c.bf16 %v238_v56, %v237_v55  ;;  %v278_v60 = vpack.c.bf16 %v248_v59, %v247_v58  ;;  %v236_v62 = vld [vmem:[#allocation3 + $0x38] sm:$0xff]  ;;  %v245_v0 = vld [vmem:[#allocation3 + $0x80] sm:$0xff]  ;;  %v246_v1 = vld [vmem:[#allocation3 + $0x88] sm:$0xff] }
  0x15   :  { %100 = vmatpush.bf16.msrb.mxu0 %v73_v22  ;;  %319 = vmatpush.bf16.msra.mxu1 %v283_v33  ;;  %v272_v63 = vpack.c.bf16 %v236_v62, %v235_v61  ;;  %v277_v2 = vpack.c.bf16 %v246_v1, %v245_v0  ;;  %v233_v3 = vld [vmem:[#allocation3 + $0x20] sm:$0xff]  ;;  %v234_v4 = vld [vmem:[#allocation3 + $0x28] sm:$0xff]  ;;  %v231_v6 = vld [vmem:[#allocation3 + $0x10] sm:$0xff] }
  0x16   :  { %v271_v5 = vpack.c.bf16 %v234_v4, %v233_v3  ;;  %v232_v7 = vld [vmem:[#allocation3 + $0x18] sm:$0xff]  ;;  %v229_v10 = vld [vmem:[#allocation3] sm:$0xff]  ;;  %v230_v11 = vld [vmem:[#allocation3 + $0x8] sm:$0xff] }
  0x17   :  { %v270_v8 = vpack.c.bf16 %v232_v7, %v231_v6  ;;  %v269_v12 = vpack.c.bf16 %v230_v11, %v229_v10  ;;  %v120_v15 = vld [vmem:[%s1552_s4] sm:$0x3]  ;;  %v370_v58 = vld [vmem:[%s1555_s7 + $0x78] sm:$0xff] }
  0x18   :  { %842 = vmatpush.bf16.msrb.mxu3 %v275_v46  ;;  %v123_v17 = vperm.slane %v120_v15, 1  ;;  %v122_v32 = vperm.slane %v120_v15, 0 }
  0x19   :  { %135 = vmatpush.bf16.msra.mxu0 %v118_v24  ;;  %320 = vmatpush.bf16.msra.mxu1 %v282_v36 }
  0x1c   :  { %843 = vmatpush.bf16.msrb.mxu3 %v274_v51 }
  0x1d   :  { %136 = vmatpush.bf16.msra.mxu0 %v116_v30  ;;  %321 = vmatpush.bf16.msra.mxu1 %v281_v42 }
  0x20   :  { %838 = vmatmul.msk.bf16.vlgmr.msrb.gmra.mxu0 %vm76_vm0, %v71_v21  ;;  %844 = vmatpush.bf16.msrb.mxu3 %v273_v57 }
  0x21   :  { %289 = vmatpush.bf16.msrb.mxu0 %v276_v39  ;;  %322 = vmatpush.bf16.msra.mxu1 %v280_v48 }
  0x24   :  { %845 = vmatpush.bf16.msrb.mxu3 %v272_v63 }
  0x25   :  { %290 = vmatpush.bf16.msrb.mxu0 %v275_v46  ;;  %323 = vmatpush.bf16.msra.mxu1 %v279_v54 }
  0x28   :  { %846 = vmatpush.bf16.msrb.mxu3 %v271_v5 }
  0x29   :  { %291 = vmatpush.bf16.msrb.mxu0 %v274_v51  ;;  %324 = vmatpush.bf16.msra.mxu1 %v278_v60 }
  0x2c   :  { %847 = vmatpush.bf16.msrb.mxu3 %v270_v8 }
  0x2d   :  { %292 = vmatpush.bf16.msrb.mxu0 %v273_v57  ;;  %325 = vmatpush.bf16.msra.mxu1 %v277_v2  ;;  %v369_v57 = vld [vmem:[%s1555_s7 + $0x70] sm:$0xff] }
  0x2e   :  { %v382_v59 = vpack.c.bf16 %v370_v58, %v369_v57 }
  0x30   :  { %839 = vmatmul.msk.bf16.vlgmr.msra.gmra.mxu0 %vm76_vm0, %v115_v23  ;;  %848 = vmatpush.bf16.msrb.mxu3 %v269_v12 }
  0x31   :  { %293 = vmatpush.bf16.msrb.mxu0 %v272_v63  ;;  %387 = vmatpush.bf16.msra.mxu2 %v382_v59 }
  0x35   :  { %294 = vmatpush.bf16.msrb.mxu0 %v271_v5 }
  0x39   :  { %295 = vmatpush.bf16.msrb.mxu0 %v270_v8 }
  0x3d   :  { %296 = vmatpush.bf16.msrb.mxu0 %v269_v12 }
  0x8d   :  { %v1102_v9 = vpop.f32.mrf.mxu0 }
  0x95   :  { %v91_v13 = vpop.f32.mrf.mxu0 }
  0x96   :  { %v151_v14 = vpop.f32.mrf.mxu3 }
  0x97   :  { %v1113_v22 = vadd.f32 %v151_v14, %v123_v17 }
  0x9d   :  { %v102_v16 = vpop.f32.mrf.mxu0 }
  0x9e   :  { %v153_v18 = vpop.f32.mrf.mxu3  ;;  %v1107_v19 = vrot.slane %v102_v16, 7 }
  0xa0   :  { %v159_v20 = vsel %vm158_vm1, %v1102_v9, %v1107_v19  ;;  %v161_v21 = vsel %vm160_vm2, %v1102_v9, %v1107_v19  ;;  %v164_v30 = vsel %vm163_vm3, %v1102_v9, %v1107_v19  ;;  %v167_v31 = vsel %vm166_vm4, %v1102_v9, %v1107_v19 }
  0xa1   :  { %v162_v23 = vrot.slane %v161_v21, 1  ;;  %v182_v24 = vperm.slane %v159_v20, 1  ;;  %v165_v33 = vrot.slane %v164_v30, 2  ;;  %v168_v34 = vrot.slane %v167_v31, 3  ;;  %v362_v30 = vld [vmem:[%s1555_s7 + $0x38] sm:$0xff] }
  0xa2   :  { %v181_v35 = vperm.slane %v159_v20, 0  ;;  %v170_v52 = vsel %vm169_vm5, %v1102_v9, %v1107_v19  ;;  %v173_v53 = vsel %vm172_vm6, %v1102_v9, %v1107_v19  ;;  %v176_v5 = vsel %vm175_vm7, %v1102_v9, %v1107_v19 }
  0xa3   :  { %v184_v25 = vperm.slane %v162_v23, 1  ;;  %v214_v27 = vadd.f32 %v182_v24, %v1113_v22  ;;  %v183_v37 = vperm.slane %v162_v23, 0  ;;  %v185_v39 = vperm.slane %v165_v33, 0  ;;  %v365_v23 = vld [vmem:[%s1555_s7 + $0x50] sm:$0xff] }
  0xa4   :  { %v187_v40 = vperm.slane %v168_v34, 0  ;;  %v186_v41 = vperm.slane %v165_v33, 1  ;;  %v188_v42 = vperm.slane %v168_v34, 1  ;;  %v171_v55 = vrot.slane %v170_v52, 4  ;;  %v360_v33 = vld [vmem:[%s1555_s7 + $0x28] sm:$0xff] }
  0xa5   :  { %v104_v26 = vpop.f32.mrf.mxu0  ;;  %v216_v28 = vadd.f32 %v184_v25, %v1113_v22  ;;  %v174_v56 = vrot.slane %v173_v53, 5  ;;  %v179_v6 = vsel %vm178_vm8, %v1107_v19, %v1102_v9  ;;  %v177_v8 = vrot.slane %v176_v5, 6  ;;  %v367_v9 = vld [vmem:[%s1555_s7 + $0x60] sm:$0xff]  ;;  %v368_v19 = vld [vmem:[%s1555_s7 + $0x68] sm:$0xff] }
  0xa6   :  { %v218_v49 = vadd.f32 %v186_v41, %v1113_v22  ;;  %v220_v50 = vadd.f32 %v188_v42, %v1113_v22  ;;  %v189_v60 = vperm.slane %v171_v55, 0  ;;  %v190_v0 = vperm.slane %v171_v55, 1  ;;  %v363_v26 = vld [vmem:[%s1555_s7 + $0x40] sm:$0xff] }
  0xa7   :  { %v262_v29 = vpack.c.bf16 %v216_v28, %v214_v27  ;;  %v191_v61 = vperm.slane %v174_v56, 0  ;;  %v192_v1 = vperm.slane %v174_v56, 1  ;;  %v180_v10 = vrot.slane %v179_v6, 7  ;;  %v364_v27 = vld [vmem:[%s1555_s7 + $0x48] sm:$0xff] }
  0xa8   :  { %v264_v54 = vpack.c.bf16 %v220_v50, %v218_v49  ;;  %v222_v3 = vadd.f32 %v190_v0, %v1113_v22  ;;  %v193_v11 = vperm.slane %v177_v8, 0  ;;  %v194_v15 = vperm.slane %v177_v8, 1 }
  0xa9   :  { %326 = vmatmul.bf16.vlgmr.msra.gmra.mxu1 %v262_v29  ;;  %v224_v4 = vadd.f32 %v192_v1, %v1113_v22  ;;  %v195_v12 = vperm.slane %v180_v10, 0  ;;  %v196_v16 = vperm.slane %v180_v10, 1  ;;  %v381_v24 = vpack.c.bf16 %v368_v19, %v367_v9  ;;  %v361_v29 = vld [vmem:[%s1555_s7 + $0x30] sm:$0xff] }
  0xaa   :  { %v226_v18 = vadd.f32 %v194_v15, %v1113_v22  ;;  %v379_v28 = vpack.c.bf16 %v364_v27, %v363_v26  ;;  %v378_v31 = vpack.c.bf16 %v362_v30, %v361_v29 }
  0xab   :  { %v266_v7 = vpack.c.bf16 %v224_v4, %v222_v3  ;;  %v228_v20 = vadd.f32 %v196_v16, %v1113_v22  ;;  %v366_v22 = vld [vmem:[%s1555_s7 + $0x58] sm:$0xff]  ;;  %388 = vmatpush.bf16.msra.mxu2 %v381_v24 }
  0xac   :  { %v380_v25 = vpack.c.bf16 %v366_v22, %v365_v23  ;;  %v859_v23 = vld [vmem:[%s1556_s8] ss:$0 sm:$0xff] }
  0xad   :  { %v138_v36 = vpop.f32.mrf.mxu0  ;;  %v268_v21 = vpack.c.bf16 %v228_v20, %v226_v18 }
  0xae   :  { %v139_v38 = vadd.f32 %v138_v36, %v122_v32  ;;  %v359_v32 = vld [vmem:[%s1555_s7 + $0x20] sm:$0xff]  ;;  %v358_v36 = vld [vmem:[%s1555_s7 + $0x18] sm:$0xff] }
  0xaf   :  { %389 = vmatpush.bf16.msra.mxu2 %v380_v25  ;;  %v377_v34 = vpack.c.bf16 %v360_v33, %v359_v32  ;;  %v860_v25 = vld [vmem:[%s1557_s9] ss:$0 sm:$0xff] }
  0xb0   :  { %v213_v43 = vadd.f32 %v181_v35, %v139_v38  ;;  %v215_v44 = vadd.f32 %v183_v37, %v139_v38  ;;  %v217_v45 = vadd.f32 %v185_v39, %v139_v38  ;;  %v219_v46 = vadd.f32 %v187_v40, %v139_v38  ;;  %v357_v35 = vld [vmem:[%s1555_s7 + $0x10] sm:$0xff]  ;;  %v356_v39 = vld [vmem:[%s1555_s7 + $0x8] sm:$0xff] }
  0xb1   :  { %v221_v62 = vadd.f32 %v189_v60, %v139_v38  ;;  %v223_v63 = vadd.f32 %v191_v61, %v139_v38  ;;  %v225_v13 = vadd.f32 %v193_v11, %v139_v38  ;;  %v227_v14 = vadd.f32 %v195_v12, %v139_v38  ;;  %v355_v38 = vld [vmem:[%s1555_s7] sm:$0xff] }
  0xb2   :  { %v261_v47 = vpack.c.bf16 %v215_v44, %v213_v43  ;;  %v263_v48 = vpack.c.bf16 %v219_v46, %v217_v45  ;;  %v376_v37 = vpack.c.bf16 %v358_v36, %v357_v35  ;;  %v375_v40 = vpack.c.bf16 %v356_v39, %v355_v38  ;;  %v858_v44 = vld [vmem:[%s1554_s6] ss:$0 sm:$0xff] }
  0xb3   :  { %v265_v2 = vpack.c.bf16 %v223_v63, %v221_v62  ;;  %v267_v17 = vpack.c.bf16 %v227_v14, %v225_v13  ;;  %390 = vmatpush.bf16.msra.mxu2 %v379_v28 }
  0xb4   :  { %297 = vmatmul.bf16.vlgmr.msrb.gmra.mxu0 %v261_v47  ;;  %302 = vmatmul.bf16.vlgmr.msrb.gmra.mxu3 %v263_v48 }
  0xb5   :  { %v140_v51 = vpop.f32.mrf.mxu0 }
  0xb7   :  { %391 = vmatpush.bf16.msra.mxu2 %v378_v31 }
  0xb9   :  { %331 = vmatmul.bf16.gmra.mxu1 %v264_v54 }
  0xbb   :  { %392 = vmatpush.bf16.msra.mxu2 %v377_v34 }
  0xbf   :  { %393 = vmatpush.bf16.msra.mxu2 %v376_v37 }
  0xc3   :  { %394 = vmatpush.bf16.msra.mxu2 %v375_v40 }
  0xc4   :  { %307 = vmatmul.bf16.gmra.mxu3 %v265_v2 }
  0xc9   :  { %336 = vmatmul.bf16.gmra.mxu1 %v266_v7 }
  0xd4   :  { %312 = vmatmul.bf16.gmra.mxu3 %v267_v17 }
  0xd9   :  { %341 = vmatmul.bf16.gmra.mxu1 %v268_v21 }
 0x126   :  { %v327_v41 = vpop.f32.mrf.mxu1 }
 0x12e   :  { %v329_v42 = vpop.f32.mrf.mxu1 }
 0x131   :  { %v298_v43 = vpop.f32.mrf.mxu0 }
 0x132   :  { %v299_v45 = vadd.f32 %v858_v44, %v298_v43 }
 0x134   :  { %v328_v49 = vadd.f32 %v327_v41, %v299_v45 }
 0x136   :  { %v332_v46 = vpop.f32.mrf.mxu1  ;;  %v347_v52 = vmax.f32 %v328_v49, 0.0 }
 0x137   :  { %v303_v47 = vpop.f32.mrf.mxu3 }
 0x138   :  { %v304_v58 = vadd.f32 %v858_v44, %v303_v47 }
 0x139   :  { %v300_v48 = vpop.f32.mrf.mxu0 }
 0x13a   :  { %v301_v50 = vadd.f32 %v858_v44, %v300_v48  ;;  %v333_v62 = vadd.f32 %v332_v46, %v304_v58 }
 0x13c   :  { %v330_v51 = vadd.f32 %v329_v42, %v301_v50  ;;  %v349_v0 = vmax.f32 %v333_v62, 0.0 }
 0x13e   :  { %v348_v53 = vmax.f32 %v330_v51, 0.0  ;;  %v334_v54 = vpop.f32.mrf.mxu1 }
 0x13f   :  { %v305_v55 = vpop.f32.mrf.mxu3 }
 0x140   :  { %v371_v56 = vpack.c.bf16 %v348_v53, %v347_v52  ;;  %v306_v57 = vadd.f32 %v858_v44, %v305_v55 }
 0x142   :  { %395 = vmatmul.bf16.vlgmr.msra.gmra.mxu2 %v371_v56  ;;  %v335_v60 = vadd.f32 %v334_v54, %v306_v57 }
 0x144   :  { %v350_v63 = vmax.f32 %v335_v60, 0.0 }
 0x146   :  { %v337_v61 = vpop.f32.mrf.mxu1  ;;  %v372_v2 = vpack.c.bf16 %v350_v63, %v349_v0  ;;  %v1203_v0 = vstv %s1558_s10 }
 0x147   :  { %v308_v59 = vpop.f32.mrf.mxu3 }
 0x148   :  { %v309_v5 = vadd.f32 %v858_v44, %v308_v59 }
 0x14a   :  { %v338_v8 = vadd.f32 %v337_v61, %v309_v5 }
 0x14c   :  { %v351_v12 = vmax.f32 %v338_v8, 0.0 }
 0x14e   :  { %v339_v3 = vpop.f32.mrf.mxu1 }
 0x14f   :  { %v310_v1 = vpop.f32.mrf.mxu3 }
 0x150   :  { %v311_v4 = vadd.f32 %v858_v44, %v310_v1 }
 0x152   :  { %400 = vmatmul.bf16.gmra.mxu2 %v372_v2  ;;  %v340_v7 = vadd.f32 %v339_v3, %v311_v4 }
 0x154   :  { %v352_v10 = vmax.f32 %v340_v7, 0.0 }
 0x156   :  { %v342_v11 = vpop.f32.mrf.mxu1  ;;  %v373_v13 = vpack.c.bf16 %v352_v10, %v351_v12 }
 0x157   :  { %v313_v6 = vpop.f32.mrf.mxu3 }
 0x158   :  { %v314_v16 = vadd.f32 %v858_v44, %v313_v6 }
 0x15a   :  { %v343_v20 = vadd.f32 %v342_v11, %v314_v16 }
 0x15c   :  { %v353_v9 = vmax.f32 %v343_v20, 0.0 }
 0x15e   :  { %v344_v17 = vpop.f32.mrf.mxu1 }
 0x15f   :  { %v315_v14 = vpop.f32.mrf.mxu3 }
 0x160   :  { %v316_v15 = vadd.f32 %v858_v44, %v315_v14 }
 0x162   :  { %405 = vmatmul.bf16.gmra.mxu2 %v373_v13  ;;  %v345_v18 = vadd.f32 %v344_v17, %v316_v15 }
 0x164   :  { %v354_v21 = vmax.f32 %v345_v18, 0.0 }
 0x166   :  { %v374_v19 = vpack.c.bf16 %v354_v21, %v353_v9 }
 0x172   :  { %410 = vmatmul.bf16.gmra.mxu2 %v374_v19 }
 0x1c5   :  { %v396_v24 = vpop.f32.mrf.mxu2 }
 0x1c6   :  { %v397_v22 = vadd.f32 %v859_v23, %v396_v24 }
 0x1c8   :  { %v416_v26 = vmax.f32 %v397_v22, 0.0 }
 0x1ca   :  { %v428_v27 = vmul.f32 %v860_v25, %v416_v26 }
 0x1cc   :  { %v437_v28 = vsel %vm436_vm9, %v428_v27, 0.0 }
 0x1cd   :  { %v398_v29 = vpop.f32.mrf.mxu2  ;;  %438 = vadd.xlane.f32.xlu0 %v437_v28 }
 0x1ce   :  { %v399_v30 = vadd.f32 %v859_v23, %v398_v29 }
 0x1d0   :  { %v417_v31 = vmax.f32 %v399_v30, 0.0 }
 0x1d2   :  { %v429_v32 = vmul.f32 %v860_v25, %v417_v31 }
 0x1d4   :  { %v440_v33 = vsel %vm436_vm9, %v429_v32, 0.0 }
 0x1d5   :  { %v401_v34 = vpop.f32.mrf.mxu2  ;;  %441 = vadd.xlane.f32.xlu0 %v440_v33 }
 0x1d6   :  { %v402_v35 = vadd.f32 %v859_v23, %v401_v34 }
 0x1d8   :  { %v418_v36 = vmax.f32 %v402_v35, 0.0 }
 0x1da   :  { %v430_v37 = vmul.f32 %v860_v25, %v418_v36 }
 0x1dc   :  { %v443_v38 = vsel %vm436_vm9, %v430_v37, 0.0 }
 0x1dd   :  { %v403_v39 = vpop.f32.mrf.mxu2  ;;  %444 = vadd.xlane.f32.xlu1 %v443_v38 }
 0x1de   :  { %v404_v40 = vadd.f32 %v859_v23, %v403_v39 }
 0x1e0   :  { %v419_v41 = vmax.f32 %v404_v40, 0.0 }
 0x1e2   :  { %v431_v42 = vmul.f32 %v860_v25, %v419_v41 }
 0x1e4   :  { %v446_v43 = vsel %vm436_vm9, %v431_v42, 0.0 }
 0x1e5   :  { %v406_v44 = vpop.f32.mrf.mxu2  ;;  %447 = vadd.xlane.f32.xlu1 %v446_v43 }
 0x1e6   :  { %v407_v45 = vadd.f32 %v859_v23, %v406_v44 }
 0x1e8   :  { %v420_v46 = vmax.f32 %v407_v45, 0.0 }
 0x1ea   :  { %v432_v47 = vmul.f32 %v860_v25, %v420_v46 }
 0x1ec   :  { %v449_v48 = vsel %vm436_vm9, %v432_v47, 0.0 }
 0x1ed   :  { %v408_v49 = vpop.f32.mrf.mxu2  ;;  %450 = vadd.xlane.f32.xlu2 %v449_v48 }
 0x1ee   :  { %v409_v50 = vadd.f32 %v859_v23, %v408_v49 }
 0x1f0   :  { %v421_v51 = vmax.f32 %v409_v50, 0.0 }
 0x1f2   :  { %v433_v52 = vmul.f32 %v860_v25, %v421_v51 }
 0x1f4   :  { %v452_v53 = vsel %vm436_vm9, %v433_v52, 0.0 }
 0x1f5   :  { %v411_v54 = vpop.f32.mrf.mxu2  ;;  %453 = vadd.xlane.f32.xlu2 %v452_v53 }
 0x1f6   :  { %v412_v55 = vadd.f32 %v859_v23, %v411_v54 }
 0x1f8   :  { %v422_v56 = vmax.f32 %v412_v55, 0.0 }
 0x1fa   :  { %v434_v57 = vmul.f32 %v860_v25, %v422_v56 }
 0x1fc   :  { %v455_v58 = vsel %vm436_vm9, %v434_v57, 0.0 }
 0x1fd   :  { %v413_v59 = vpop.f32.mrf.mxu2  ;;  %456 = vadd.xlane.f32.xlu0 %v455_v58 }
 0x1fe   :  { %v414_v60 = vadd.f32 %v859_v23, %v413_v59 }
 0x200   :  { %v423_v61 = vmax.f32 %v414_v60, 0.0 }
 0x202   :  { %v435_v62 = vmul.f32 %v860_v25, %v423_v61  ;;  %v471_v25 = vlaneseq }
 0x204   :  { %v458_v63 = vsel %vm436_vm9, %v435_v62, 0.0  ;;  %v1230_v33 = vshrl.u32 %v471_v25, 7 }
 0x205   :  { %459 = vadd.xlane.f32.xlu1 %v458_v63 }
 0x206   :  { %v1237_v42 = vshra.s32 %v1230_v33, 3  ;;  %v499_v46 = vand.u32 7, %v1230_v33  ;;  %v473_v47 = vadd.s32 8, %v1230_v33 }
 0x208   :  { %vm516_vm10 = vcmp.lt.s32.totalorder %v1237_v42, 8  ;;  %vm1248_vm11 = vcmp.eq.s32.totalorder %v1237_v42, %v499_v46  ;;  %v1252_v57 = vshra.s32 %v473_v47, 3  ;;  %vm1257_vm12 = vcmp.ne.s32.totalorder %v1237_v42, %v499_v46 }
 0x209   :  { %vm1292_vm0 = vmand %vm516_vm10, %vm1248_vm11 }
 0x20a   :  { %vm517_vm13 = vcmp.lt.s32.totalorder %v1252_v57, 8  ;;  %vm1321_vm2 = vmand %vm516_vm10, %vm1257_vm12 }
 0x240   :  { %v439_v1 = vpop.xlane.xlu0 %438 }
 0x241   :  { %v1206_v2 = vadd.f32 %v1203_v0, %v439_v1 }
 0x243   :  { %v580_v3 = vand.u32 2147483647, %v1206_v2  ;;  %v685_v4 = vsub.f32 0.0, %v1206_v2 }
 0x245   :  { %v588_v5 = vsub.f32 0.0, %v580_v3  ;;  %v701_v6 = vand.u32 2147483647, %v685_v4  ;;  %v572_v3 = vmax.f32 %v1206_v2, 0.0 }
 0x247   :  { %v596_v10 = vmul.f32 1.442695, %v588_v5  ;;  %v709_v11 = vsub.f32 0.0, %v701_v6  ;;  %v693_v5 = vmax.f32 %v685_v4, 0.0  ;;  %v500_v6 = vand.u32 7, %v473_v47 }
 0x248   :  { %v442_v7 = vpop.xlane.xlu0 %441 }
 0x249   :  { %v1213_v8 = vadd.f32 %v1203_v0, %v442_v7  ;;  %861 = vpow2.f32 %v596_v10  ;;  %v717_v16 = vmul.f32 1.442695, %v709_v11  ;;  %v1265_v7 = vadd.s32 16, %v1230_v33 }
 0x24a   :  { %vm1272_vm15 = vcmp.eq.s32.totalorder %v1252_v57, %v500_v6  ;;  %vm1297_vm1 = vcmp.ne.s32.totalorder %v1252_v57, %v500_v6 }
 0x24b   :  { %v581_v12 = vand.u32 2147483647, %v1213_v8  ;;  %v686_v13 = vsub.f32 0.0, %v1213_v8  ;;  %863 = vpow2.f32 %v717_v16  ;;  %vm1338_vm5 = vmand %vm517_vm13, %vm1272_vm15 }
 0x24c   :  { %vm565_vm7 = vmand %vm517_vm13, %vm1297_vm1 }
 0x24d   :  { %v589_v14 = vsub.f32 0.0, %v581_v12  ;;  %v702_v15 = vand.u32 2147483647, %v686_v13 }
 0x24f   :  { %v598_v17 = vmul.f32 1.442695, %v589_v14  ;;  %v710_v20 = vsub.f32 0.0, %v702_v15  ;;  %v862_v23 = vpop.eup %861 }
 0x250   :  { %v445_v18 = vpop.xlane.xlu1 %444  ;;  %v612_v26 = vadd.f32 1.0, %v862_v23 }
 0x251   :  { %v1220_v21 = vadd.f32 %v1203_v0, %v445_v18  ;;  %865 = vpow2.f32 %v598_v17  ;;  %v719_v24 = vmul.f32 1.442695, %v710_v20  ;;  %v864_v30 = vpop.eup %863  ;;  %v1277_v20 = vadd.s32 24, %v1230_v33 }
 0x252   :  { %v733_v35 = vadd.f32 1.0, %v864_v30  ;;  %v501_v30 = vand.u32 7, %v1265_v7 }
 0x253   :  { %v582_v9 = vand.u32 2147483647, %v1220_v21  ;;  %v687_v19 = vsub.f32 0.0, %v1220_v21  ;;  %867 = vpow2.f32 %v719_v24  ;;  %v573_v24 = vmax.f32 %v1213_v8, 0.0 }
 0x254   :  { %869 = vlog2.f32 %v612_v26  ;;  %v502_v47 = vand.u32 7, %v1277_v20 }
 0x255   :  { %v590_v22 = vsub.f32 0.0, %v582_v9  ;;  %v703_v27 = vand.u32 2147483647, %v687_v19  ;;  %v1309_v46 = vmax.f32 %v687_v19, 0.0 }
 0x257   :  { %v600_v28 = vmul.f32 1.442695, %v590_v22  ;;  %v866_v32 = vpop.eup %865  ;;  %v711_v34 = vsub.f32 0.0, %v703_v27  ;;  %v1282_v22 = vshra.s32 %v1265_v7, 3 }
 0x258   :  { %v448_v29 = vpop.xlane.xlu1 %447  ;;  %v613_v38 = vadd.f32 1.0, %v866_v32 }
 0x259   :  { %v1227_v31 = vadd.f32 %v1203_v0, %v448_v29  ;;  %871 = vpow2.f32 %v600_v28  ;;  %v868_v40 = vpop.eup %867  ;;  %v721_v41 = vmul.f32 1.442695, %v711_v34  ;;  %v694_v29 = vmax.f32 %v686_v13, 0.0 }
 0x25a   :  { %873 = vlog2.f32 %v733_v35  ;;  %v870_v45 = vpop.eup %869  ;;  %v734_v50 = vadd.f32 1.0, %v868_v40  ;;  %vm518_vm3 = vcmp.lt.s32.totalorder %v1282_v22, 8  ;;  %vm1327_vm4 = vcmp.eq.s32.totalorder %v1282_v22, %v501_v30 }
 0x25b   :  { %v583_v36 = vand.u32 2147483647, %v1227_v31  ;;  %v688_v37 = vsub.f32 0.0, %v1227_v31  ;;  %875 = vlog2.f32 %v613_v38  ;;  %v621_v56 = vmul.f32 0.6931472, %v870_v45  ;;  %vm1391_vm10 = vmand %vm518_vm3, %vm1327_vm4 }
 0x25c   :  { %877 = vpow2.f32 %v721_v41  ;;  %v574_v41 = vmax.f32 %v1220_v21, 0.0  ;;  %vm1360_vm6 = vcmp.ne.s32.totalorder %v1282_v22, %v501_v30 }
 0x25d   :  { %v704_v39 = vand.u32 2147483647, %v688_v37  ;;  %v591_v43 = vsub.f32 0.0, %v583_v36  ;;  %879 = vlog2.f32 %v734_v50  ;;  %v636_v15 = vadd.f32 %v621_v56, %v572_v3  ;;  %vm566_vm15 = vmand %vm518_vm3, %vm1360_vm6 }
 0x25f   :  { %v872_v49 = vpop.eup %871  ;;  %v712_v51 = vsub.f32 0.0, %v704_v39  ;;  %v602_v52 = vmul.f32 1.442695, %v591_v43  ;;  %v644_v28 = vsub.f32 0.0, %v636_v15  ;;  %v1305_v43 = vshra.s32 %v1277_v20, 3 }
 0x260   :  { %v451_v44 = vpop.xlane.xlu2 %450  ;;  %v614_v58 = vadd.f32 1.0, %v872_v49  ;;  %v874_v59 = vpop.eup %873 }
 0x261   :  { %v1242_v48 = vadd.f32 %v1203_v0, %v451_v44  ;;  %v723_v60 = vmul.f32 1.442695, %v712_v51  ;;  %v876_v63 = vpop.eup %875  ;;  %881 = vpow2.f32 %v602_v52  ;;  %v742_v17 = vmul.f32 0.6931472, %v874_v59 }
 0x262   :  { %v878_v14 = vpop.eup %877  ;;  %883 = vlog2.f32 %v614_v58  ;;  %v623_v2 = vmul.f32 0.6931472, %v876_v63  ;;  %v652_v52 = vsel %vm1292_vm0, %v644_v28, 0.0  ;;  %vm519_vm8 = vcmp.lt.s32.totalorder %v1305_v43, 8 }
 0x263   :  { %v584_v53 = vand.u32 2147483647, %v1242_v48  ;;  %v689_v54 = vsub.f32 0.0, %v1242_v48  ;;  %885 = vpow2.f32 %v723_v60  ;;  %v880_v23 = vpop.eup %879  ;;  %v735_v26 = vadd.f32 1.0, %v878_v14 }
 0x264   :  { %v757_v36 = vadd.f32 %v742_v17, %v693_v5  ;;  %v637_v8 = vadd.f32 %v623_v2, %v573_v24  ;;  %v744_v40 = vmul.f32 0.6931472, %v880_v23  ;;  %v1332_v60 = vadd.s32 32, %v1230_v33 }
 0x265   :  { %v592_v61 = vsub.f32 0.0, %v584_v53  ;;  %v705_v62 = vand.u32 2147483647, %v689_v54  ;;  %vm1382_vm9 = vcmp.eq.s32.totalorder %v1305_v43, %v502_v47  ;;  %vm1426_vm13 = vcmp.ne.s32.totalorder %v1305_v43, %v502_v47 }
 0x266   :  { %v765_v19 = vsub.f32 0.0, %v757_v36  ;;  %v645_v56 = vsub.f32 0.0, %v637_v8  ;;  %vm551_vm1 = vmand %vm519_vm8, %vm1382_vm9 }
 0x267   :  { %v604_v10 = vmul.f32 1.442695, %v592_v61  ;;  %v713_v11 = vsub.f32 0.0, %v705_v62  ;;  %v882_v34 = vpop.eup %881  ;;  %v758_v61 = vadd.f32 %v744_v40, %v694_v29  ;;  %v575_v62 = vmax.f32 %v1227_v31, 0.0  ;;  %vm1477_vm9 = vmand %vm519_vm8, %vm1426_vm13 }
 0x268   :  { %v454_v12 = vpop.xlane.xlu2 %453  ;;  %v884_v39 = vpop.eup %883  ;;  %v615_v53 = vadd.f32 1.0, %v882_v34  ;;  %v773_v15 = vsel %vm1321_vm2, %v765_v19, 0.0  ;;  %v653_v17 = vsel %vm1338_vm5, %v645_v56, 0.0 }
 0x269   :  { %v1269_v16 = vadd.f32 %v1203_v0, %v454_v12  ;;  %v725_v4 = vmul.f32 1.442695, %v713_v11  ;;  %887 = vpow2.f32 %v604_v10  ;;  %v886_v45 = vpop.eup %885  ;;  %v625_v5 = vmul.f32 0.6931472, %v884_v39 }
 0x26a   :  { %v736_v63 = vadd.f32 1.0, %v886_v45  ;;  %v661_v10 = vsel %vm660_vm14, %v652_v52, 0.0  ;;  %v1348_v11 = vmax.f32 %v688_v37, 0.0  ;;  %v1365_v34 = vsel %vm660_vm14, %v773_v15, 0.0 }
 0x26b   :  { %v585_v9 = vand.u32 2147483647, %v1269_v16  ;;  %v690_v27 = vsub.f32 0.0, %v1269_v16  ;;  %889 = vpow2.f32 %v725_v4  ;;  %v1357_v4 = vshra.s32 %v1332_v60, 3 }
 0x26c   :  { %891 = vlog2.f32 %v735_v26  ;;  %v638_v26 = vadd.f32 %v625_v5, %v574_v41  ;;  %v662_v8 = vsel %vm660_vm14, %v653_v17, 0.0  ;;  %v503_v39 = vand.u32 7, %v1332_v60 }
 0x26d   :  { %v593_v32 = vsub.f32 0.0, %v585_v9  ;;  %v706_v13 = vand.u32 2147483647, %v690_v27  ;;  %v766_v9 = vsub.f32 0.0, %v758_v61  ;;  %v1398_v56 = vadd.f32 %v662_v8, %v661_v10 }
 0x26e   :  { %v646_v45 = vsub.f32 0.0, %v638_v26  ;;  %v1403_v60 = vadd.s32 40, %v1230_v33  ;;  %vm520_vm11 = vcmp.lt.s32.totalorder %v1357_v4, 8  ;;  %vm1414_vm12 = vcmp.eq.s32.totalorder %v1357_v4, %v503_v39 }
 0x26f   :  { %v606_v44 = vmul.f32 1.442695, %v593_v32  ;;  %v714_v49 = vsub.f32 0.0, %v706_v13  ;;  %v888_v51 = vpop.eup %887  ;;  %v1421_v10 = vadd.s32 56, %v1230_v33  ;;  %vm1439_vm0 = vcmp.ne.s32.totalorder %v1357_v4, %v503_v39  ;;  %vm552_vm6 = vmand %vm520_vm11, %vm1414_vm12 }
 0x270   :  { %v457_v50 = vpop.xlane.xlu0 %456  ;;  %v616_v6 = vadd.f32 1.0, %v888_v51  ;;  %v486_v37 = vshra.s32 %v1403_v60, 3  ;;  %vm568_vm8 = vmand %vm520_vm11, %vm1439_vm0 }
 0x271   :  { %893 = vpow2.f32 %v606_v44  ;;  %v1315_v55 = vadd.f32 %v1203_v0, %v457_v50  ;;  %v727_v59 = vmul.f32 1.442695, %v714_v49  ;;  %v890_v3 = vpop.eup %889  ;;  %v774_v44 = vsel %vm565_vm7, %v766_v9, 0.0 }
 0x272   :  { %v892_v14 = vpop.eup %891  ;;  %v737_v23 = vadd.f32 1.0, %v890_v3  ;;  %v576_v49 = vmax.f32 %v1242_v48, 0.0  ;;  %v1406_v61 = vsel %vm660_vm14, %v774_v44, 0.0  ;;  %v654_v3 = vsel %vm1391_vm10, %v646_v45, 0.0 }
 0x273   :  { %v586_v1 = vand.u32 2147483647, %v1315_v55  ;;  %895 = vpow2.f32 %v727_v59  ;;  %v691_v7 = vsub.f32 0.0, %v1315_v55  ;;  %v746_v30 = vmul.f32 0.6931472, %v892_v14 }
 0x274   :  { %897 = vlog2.f32 %v615_v53  ;;  %v697_v53 = vmax.f32 %v689_v54, 0.0  ;;  %v1410_v54 = vadd.s32 48, %v1230_v33  ;;  %vm521_vm2 = vcmp.lt.s32.totalorder %v486_v37, 8 }
 0x275   :  { %v594_v12 = vsub.f32 0.0, %v586_v1  ;;  %v707_v2 = vand.u32 2147483647, %v691_v7  ;;  %899 = vlog2.f32 %v736_v63  ;;  %v759_v52 = vadd.f32 %v746_v30, %v1309_v46 }
 0x276   :  { %901 = vlog2.f32 %v616_v6  ;;  %v577_v46 = vmax.f32 %v1269_v16, 0.0  ;;  %v1446_v31 = vshra.s32 %v1410_v54, 3 }
 0x277   :  { %v894_v18 = vpop.eup %893  ;;  %v608_v24 = vmul.f32 1.442695, %v594_v12  ;;  %v715_v29 = vsub.f32 0.0, %v707_v2  ;;  %v767_v15 = vsub.f32 0.0, %v759_v52  ;;  %v698_v2 = vmax.f32 %v690_v27, 0.0 }
 0x278   :  { %v617_v28 = vadd.f32 1.0, %v894_v18  ;;  %v460_v32 = vpop.xlane.xlu1 %459  ;;  %v664_v27 = vsel %vm660_vm14, %v654_v3, 0.0  ;;  %vm522_vm3 = vcmp.lt.s32.totalorder %v1446_v31, 8 }
 0x279   :  { %903 = vpow2.f32 %v608_v24  ;;  %v1372_v35 = vadd.f32 %v1203_v0, %v460_v32  ;;  %v896_v36 = vpop.eup %895  ;;  %v729_v13 = vmul.f32 1.442695, %v715_v29  ;;  %v504_v32 = vand.u32 7, %v1403_v60 }
 0x27a   :  { %905 = vlog2.f32 %v617_v28  ;;  %v898_v40 = vpop.eup %897  ;;  %v738_v41 = vadd.f32 1.0, %v896_v36  ;;  %v775_v28 = vsel %vm566_vm15, %v767_v15, 0.0  ;;  %v665_v15 = vadd.f32 %v664_v27, %v1398_v56 }
 0x27b   :  { %907 = vlog2.f32 %v737_v23  ;;  %v587_v38 = vand.u32 2147483647, %v1372_v35  ;;  %v692_v57 = vsub.f32 0.0, %v1372_v35  ;;  %v900_v50 = vpop.eup %899  ;;  %v627_v59 = vmul.f32 0.6931472, %v898_v40 }
 0x27c   :  { %909 = vpow2.f32 %v729_v13  ;;  %v902_v19 = vpop.eup %901  ;;  %v748_v47 = vmul.f32 0.6931472, %v900_v50  ;;  %v505_v13 = vand.u32 7, %v1410_v54  ;;  %vm1464_vm5 = vcmp.eq.s32.totalorder %v486_v37, %v504_v32 }
 0x27d   :  { %911 = vlog2.f32 %v738_v41  ;;  %v595_v21 = vsub.f32 0.0, %v587_v38  ;;  %v708_v58 = vand.u32 2147483647, %v692_v57  ;;  %v629_v17 = vmul.f32 0.6931472, %v902_v19  ;;  %vm553_vm12 = vmand %vm521_vm2, %vm1464_vm5 }
 0x27e   :  { %v639_v20 = vadd.f32 %v627_v59, %v575_v62  ;;  %v1449_v62 = vshra.s32 %v1421_v10, 3  ;;  %v760_v36 = vadd.f32 %v748_v47, %v1348_v11  ;;  %v578_v41 = vmax.f32 %v1315_v55, 0.0 }
 0x27f   :  { %v904_v42 = vpop.eup %903  ;;  %v610_v48 = vmul.f32 1.442695, %v595_v21  ;;  %v716_v6 = vsub.f32 0.0, %v708_v58  ;;  %v640_v29 = vadd.f32 %v629_v17, %v576_v49  ;;  %v506_v38 = vand.u32 7, %v1421_v10 }
 0x280   :  { %v906_v1 = vpop.eup %905  ;;  %v618_v5 = vadd.f32 1.0, %v904_v42  ;;  %v647_v30 = vsub.f32 0.0, %v639_v20  ;;  %v699_v11 = vmax.f32 %v691_v7, 0.0  ;;  %vm523_vm4 = vcmp.lt.s32.totalorder %v1449_v62, 8 }
 0x281   :  { %v908_v14 = vpop.eup %907  ;;  %913 = vpow2.f32 %v610_v48  ;;  %v731_v9 = vmul.f32 1.442695, %v716_v6  ;;  %v631_v24 = vmul.f32 0.6931472, %v906_v1  ;;  %v648_v50 = vsub.f32 0.0, %v640_v29 }
 0x282   :  { %v910_v18 = vpop.eup %909  ;;  %915 = vlog2.f32 %v618_v5  ;;  %v750_v22 = vmul.f32 0.6931472, %v908_v14  ;;  %v655_v21 = vsel %vm551_vm1, %v647_v30, 0.0  ;;  %v768_v19 = vsub.f32 0.0, %v760_v36 }
 0x283   :  { %v912_v16 = vpop.eup %911  ;;  %v739_v26 = vadd.f32 1.0, %v910_v18  ;;  %917 = vpow2.f32 %v731_v9  ;;  %v641_v40 = vadd.f32 %v631_v24, %v577_v46  ;;  %vm546_vm7 = vcmp.eq.s32.totalorder %v1446_v31, %v505_v13 }
 0x284   :  { %v752_v8 = vmul.f32 0.6931472, %v912_v16  ;;  %v761_v45 = vadd.f32 %v750_v22, %v697_v53  ;;  %vm1482_vm10 = vcmp.eq.s32.totalorder %v1449_v62, %v506_v38  ;;  %vm1489_vm15 = vcmp.ne.s32.totalorder %v486_v37, %v504_v32  ;;  %vm1500_vm13 = vmand %vm522_vm3, %vm546_vm7 }
 0x285   :  { %919 = vlog2.f32 %v739_v26  ;;  %v649_v7 = vsub.f32 0.0, %v641_v40  ;;  %v656_v63 = vsel %vm552_vm6, %v648_v50, 0.0  ;;  %v666_v1 = vsel %vm660_vm14, %v655_v21, 0.0  ;;  %vm569_vm11 = vmand %vm521_vm2, %vm1489_vm15 }
 0x286   :  { %v762_v59 = vadd.f32 %v752_v8, %v698_v2  ;;  %v769_v42 = vsub.f32 0.0, %v761_v45  ;;  %vm1505_vm1 = vcmp.ne.s32.totalorder %v1446_v31, %v505_v13  ;;  %v776_v12 = vsel %vm1477_vm9, %v768_v19, 0.0 }
 0x287   :  { %v914_v39 = vpop.eup %913  ;;  %v579_v4 = vmax.f32 %v1372_v35, 0.0  ;;  %v657_v14 = vsel %vm553_vm12, %v649_v7, 0.0  ;;  %v784_v17 = vsel %vm660_vm14, %v775_v28, 0.0  ;;  %v668_v18 = vsel %vm660_vm14, %v656_v63, 0.0  ;;  %vm570_vm0 = vmand %vm522_vm3, %vm1505_vm1 }
 0x288   :  { %v916_v44 = vpop.eup %915  ;;  %v619_v49 = vadd.f32 1.0, %v914_v39  ;;  %v770_v10 = vsub.f32 0.0, %v762_v59  ;;  %v777_v47 = vsel %vm568_vm8, %v769_v42, 0.0  ;;  %v783_v9 = vadd.f32 %v1406_v61, %v1365_v34  ;;  %vm555_vm3 = vmand %vm523_vm4, %vm1482_vm10 }
 0x289   :  { %v633_v51 = vmul.f32 0.6931472, %v916_v44  ;;  %v918_v52 = vpop.eup %917  ;;  %v667_v24 = vadd.f32 %v666_v1, %v665_v15  ;;  %v786_v56 = vsel %vm660_vm14, %v776_v12, 0.0  ;;  %v700_v27 = vmax.f32 %v692_v57, 0.0 }
 0x28a   :  { %921 = vlog2.f32 %v619_v49  ;;  %v740_v60 = vadd.f32 1.0, %v918_v52  ;;  %v670_v26 = vsel %vm660_vm14, %v657_v14, 0.0  ;;  %v778_v37 = vsel %vm569_vm11, %v770_v10, 0.0 }
 0x28b   :  { %v920_v55 = vpop.eup %919  ;;  %v642_v53 = vadd.f32 %v633_v51, %v578_v41  ;;  %v785_v22 = vadd.f32 %v784_v17, %v783_v9  ;;  %v669_v28 = vadd.f32 %v668_v18, %v667_v24  ;;  %vm563_vm2 = vcmp.ne.s32.totalorder %v1449_v62, %v506_v38 }
 0x28c   :  { %v754_v43 = vmul.f32 0.6931472, %v920_v55  ;;  %923 = vlog2.f32 %v740_v60  ;;  %v788_v29 = vsel %vm660_vm14, %v777_v47, 0.0  ;;  %v790_v8 = vsel %vm660_vm14, %v778_v37, 0.0  ;;  %vm571_vm5 = vmand %vm523_vm4, %vm563_vm2 }
 0x28d   :  { %v650_v54 = vsub.f32 0.0, %v642_v53  ;;  %v787_v32 = vadd.f32 %v786_v56, %v785_v22  ;;  %v671_v36 = vadd.f32 %v670_v26, %v669_v28  ;;  %v806_v63 = vand.u32 127, %v471_v25 }
 0x28e   :  { %v763_v6 = vadd.f32 %v754_v43, %v699_v11 }
 0x28f   :  { %v658_v16 = vsel %vm1500_vm13, %v650_v54, 0.0  ;;  %v789_v39 = vadd.f32 %v788_v29, %v787_v32  ;;  %vm808_vm4 = vcmp.eq.s32.totalorder %v806_v63, 0  ;;  %vm812_vm6 = vcmp.eq.s32.totalorder %v806_v63, 1 }
 0x290   :  { %v922_v2 = vpop.eup %921  ;;  %v771_v20 = vsub.f32 0.0, %v763_v6  ;;  %v672_v31 = vsel %vm660_vm14, %v658_v16, 0.0 }
 0x291   :  { %v635_v23 = vmul.f32 0.6931472, %v922_v2  ;;  %v673_v41 = vadd.f32 %v672_v31, %v671_v36  ;;  %v791_v11 = vadd.f32 %v790_v8, %v789_v39 }
 0x292   :  { %v924_v34 = vpop.eup %923  ;;  %v779_v57 = vsel %vm570_vm0, %v771_v20, 0.0 }
 0x293   :  { %v643_v61 = vadd.f32 %v635_v23, %v579_v4  ;;  %v756_v35 = vmul.f32 0.6931472, %v924_v34  ;;  %v792_v38 = vsel %vm660_vm14, %v779_v57, 0.0 }
 0x294   :  { %v793_v51 = vadd.f32 %v792_v38, %v791_v11 }
 0x295   :  { %v651_v30 = vsub.f32 0.0, %v643_v61  ;;  %v764_v13 = vadd.f32 %v756_v35, %v700_v27 }
 0x297   :  { %v659_v40 = vsel %vm555_vm3, %v651_v30, 0.0  ;;  %v772_v45 = vsub.f32 0.0, %v764_v13 }
 0x298   :  { %v674_v44 = vsel %vm660_vm14, %v659_v40, 0.0 }
 0x299   :  { %v675_v49 = vadd.f32 %v674_v44, %v673_v41  ;;  %v780_v50 = vsel %vm571_vm5, %v772_v45, 0.0 }
 0x29a   :  { %v794_v0 = vsel %vm660_vm14, %v780_v50, 0.0  ;;  %vm807_vm14 = vcmp.eq.s32.totalorder %v1230_v33, 0 }
 0x29b   :  { %676 = vadd.xlane.f32.xlu2 %v675_v49  ;;  %v795_v52 = vadd.f32 %v794_v0, %v793_v51  ;;  %vm809_vm7 = vmand %vm807_vm14, %vm808_vm4 }
 0x29c   :  { %vm813_vm9 = vmand %vm807_vm14, %vm812_vm6 }
 0x29d   :  { %796 = vadd.xlane.f32.xlu0 %v795_v52 }
 0x30e   :  { %v677_v21 = vpop.xlane.xlu2 %676 }
 0x30f   :  { %v678_v19 = vrot.slane %v677_v21, 4 }
 0x310   :  { %v797_v55 = vpop.xlane.xlu0 %796 }
 0x311   :  { %v679_v59 = vadd.f32 %v678_v19, %v677_v21  ;;  %v798_v62 = vrot.slane %v797_v55, 4 }
 0x313   :  { %v680_v7 = vrot.slane %v679_v59, 2  ;;  %v799_v53 = vadd.f32 %v798_v62, %v797_v55 }
 0x315   :  { %v681_v58 = vadd.f32 %v680_v7, %v679_v59  ;;  %v800_v60 = vrot.slane %v799_v53, 2 }
 0x317   :  { %v682_v42 = vrot.slane %v681_v58, 1  ;;  %v801_v46 = vadd.f32 %v800_v60, %v799_v53 }
 0x319   :  { %v683_v48 = vadd.f32 %v682_v42, %v681_v58  ;;  %v802_v43 = vrot.slane %v801_v46, 1 }
 0x31b   :  { %849 = vpush %v683_v48  ;;  %v803_v54 = vadd.f32 %v802_v43, %v801_v46 }
 0x31d   :  { %851 = vpush %v803_v54 }
 0x34c   :  { %s850_s10 = spop %849 }
 0x34d   :  { %v810_v1 = vstv %s850_s10 }
 0x34e   :  { %s852_s28 = spop %851  ;;  %v811_v5 = vsel %vm809_vm7, %v810_v1, 0.0 }
 0x34f   :  { %v814_v3 = vstv %s852_s28 }
 0x350   :  { %v815_v6 = vsel %vm813_vm9, %v814_v3, 0.0 }
 0x351   :  { %v816_v10 = vadd.f32 %v815_v6, %v811_v5 }
 0x353   :  { %819 = vst [vmem:[#allocation6] sm:$0xff] %v816_v10 }
 0x354   :  { %830 = dma.vmem_to_hbm [thread:$0]  %s826_s0, 128, %s828_s12, [#allocation5]  }
 0x355   :  { %975 = dma.done.wait [#allocation5], 128  }
 0x356   :  { %976 = vsyncadd [#allocation5], 4294967168 }
 0x357   :  { %835 = vsyncpa [#allocation4], 1 }
 0x358   :  { %836 = vsyncpa [#allocation5], 1 }

</bundles_post_ra>
